<compile_context>
chip_gen: v6e
topology: v6e:2x2x1
jax: 0.10.0
libtpu: 0.0.40
codegen_flags: <defaults>
</compile_context>

<pallas_src>
import jax
import jax.numpy as jnp
from jax.experimental import pallas as pl
from jax.experimental.pallas import tpu as pltpu

MATMUL_DTYPE = jnp.bfloat16        # MXU inputs; accumulation & elementwise stay f32
_VMEM_LIMIT = 32 * 1024 * 1024     # safe on v5e/v6e (128 MiB phys) and v7x (64 MiB phys)


def _round_up(x, m):
    return (x + m - 1) // m * m


def _tiles_for(n):
    """(n_pad, tm, tk) for the node axis.

    Small graphs (n <= 512): pad to a multiple of 128 lanes (clean unmasked
    vld/vst, full MXU tiles) and, above 128, split rows into two tiles so the
    parallel axis can use both TensorCores on v7x.  Large graphs: 512x512 tiles
    (A tile = 512 KiB bf16, double-buffered ~1 MiB; ~85% of HBM roofline).
    """
    if n <= 512:
        n_pad = max(_round_up(n, 128), 128)
        tm = n_pad if n_pad <= 128 else n_pad // 2
        return n_pad, tm, n_pad
    n_pad = _round_up(n, 512)
    return n_pad, 512, 512


# ----------------------------------------------------------------------------
# Kernel 1: A_hat sweep + bias + PReLU for one GCN trunk layer.
#   out = PReLU(A_hat @ XW + b), XW = X @ W precomputed once outside.
#   Single learnable PReLU alpha (scalar in SMEM).
# ----------------------------------------------------------------------------
def _a_sweep_prelu_kernel(xw_ref, a_ref, b_ref, alpha_ref, o_ref, acc_ref):
    k = pl.program_id(1)

    @pl.when(k == 0)
    def _init():
        acc_ref[...] = jnp.zeros_like(acc_ref)

    acc_ref[...] += jnp.dot(a_ref[...], xw_ref[...],
                            preferred_element_type=jnp.float32)

    @pl.when(k == pl.num_programs(1) - 1)
    def _finalize():
        z = acc_ref[...] + b_ref[...]
        alpha = alpha_ref[0]                         # scalar PReLU slope from SMEM
        o_ref[...] = jnp.where(z >= 0.0, z, alpha * z).astype(o_ref.dtype)


def a_sweep_prelu(a_hat_bf16, xw, b, alpha, *, tm, tk, out_dtype):
    """out = PReLU(A_hat @ XW + b).  a_hat:(Np,Np) bf16, xw:(Np,Fout) f32."""
    n_pad = a_hat_bf16.shape[0]
    fout = xw.shape[1]
    gi, gk = n_pad // tm, n_pad // tk

    itm = jnp.dtype(MATMUL_DTYPE).itemsize
    flops = 2 * n_pad * n_pad * fout
    bytes_accessed = (n_pad * n_pad * itm                 # A_hat (dominant stream)
                      + n_pad * fout * itm                # XW
                      + n_pad * fout * jnp.dtype(out_dtype).itemsize)

    return pl.pallas_call(
        _a_sweep_prelu_kernel,
        grid=(gi, gk),
        out_shape=jax.ShapeDtypeStruct((n_pad, fout), out_dtype),
        in_specs=[
            pl.BlockSpec((tk, fout), lambda i, k: (k, 0)),          # XW reduction tile
            pl.BlockSpec((tm, tk), lambda i, k: (i, k)),            # A_hat tile
            pl.BlockSpec((1, fout), lambda i, k: (0, 0)),           # bias
            pl.BlockSpec(memory_space=pltpu.MemorySpace.SMEM),      # PReLU alpha
        ],
        out_specs=pl.BlockSpec((tm, fout), lambda i, k: (i, 0)),
        scratch_shapes=[pltpu.VMEM((tm, fout), jnp.float32)],
        compiler_params=pltpu.CompilerParams(
            dimension_semantics=("parallel", "arbitrary"),
            vmem_limit_bytes=_VMEM_LIMIT),
        cost_estimate=pl.CostEstimate(flops=flops, transcendentals=0,
                                      bytes_accessed=bytes_accessed),
    )(xw.astype(MATMUL_DTYPE), a_hat_bf16,
      b.reshape(1, fout).astype(jnp.float32), alpha.astype(jnp.float32))


# ----------------------------------------------------------------------------
# Kernel 2: ALL K heads fused, one wide A_hat sweep per grid step.
#   acc    = A_hat @ (hgcn @ [W_mu | W_lv])      (XW precomputed outside)
#   mu     = PReLU_k(acc[:, :kd] + b_mu)         (per-head lane-wise alpha)
#   logvar = sigmoid(PReLU_k(acc[:, kd:] + b_lv))
#   hk     = eps * exp(0.5 * logvar) + mu
#   r      = sigmoid(hk @ Wr_blockdiag + b_r)
#   output = lane-dense slab [mu | logvar | hk | r | 0-pad]  (width 128-multiple)
# ----------------------------------------------------------------------------
def _heads_kernel(xw_ref, a_ref, b_ref, alpha_ref, eps_ref, wr_ref, br_ref,
                  out_ref, acc_ref):
    k = pl.program_id(1)

    @pl.when(k == 0)
    def _init():
        acc_ref[...] = jnp.zeros_like(acc_ref)

    acc_ref[...] += jnp.dot(a_ref[...], xw_ref[...],
                            preferred_element_type=jnp.float32)

    @pl.when(k == pl.num_programs(1) - 1)
    def _finalize():
        kd = eps_ref.shape[-1]
        z = acc_ref[...] + b_ref[...]
        act = jnp.where(z >= 0.0, z, alpha_ref[...] * z)   # per-head PReLU, all 2*kd lanes
        mu = act[:, :kd]
        logvar = jax.nn.sigmoid(act[:, kd:])
        hk = eps_ref[...] * jnp.exp(0.5 * logvar) + mu      # reparameterize
        r_pre = jnp.dot(hk.astype(wr_ref.dtype), wr_ref[...],
                        preferred_element_type=jnp.float32)
        r = jax.nn.sigmoid(r_pre + br_ref[...])
        slab = jnp.concatenate([mu, logvar, hk, r], axis=-1)
        pad = out_ref.shape[-1] - slab.shape[-1]
        if pad:
            slab = jnp.concatenate(
                [slab, jnp.zeros((slab.shape[0], pad), slab.dtype)], axis=-1)
        out_ref[...] = slab


def heads_fused(a_hat_bf16, xw_heads, b_all, alpha_all, eps_flat, wr_bd, b_r,
                *, tm, tk):
    n_pad = a_hat_bf16.shape[0]
    kd2 = xw_heads.shape[1]          # 2 * K * D
    kd = kd2 // 2
    k_heads = wr_bd.shape[1]
    out_w = _round_up(3 * kd + k_heads, 128)
    gi, gk = n_pad // tm, n_pad // tk

    itm = jnp.dtype(MATMUL_DTYPE).itemsize
    flops = 2 * n_pad * n_pad * kd2 + 2 * n_pad * kd * k_heads
    transcendentals = 2 * n_pad * kd + n_pad * k_heads
    bytes_accessed = (n_pad * n_pad * itm + n_pad * kd2 * itm
                      + n_pad * kd * 4 + n_pad * out_w * 4)

    return pl.pallas_call(
        _heads_kernel,
        grid=(gi, gk),
        out_shape=jax.ShapeDtypeStruct((n_pad, out_w), jnp.float32),
        in_specs=[
            pl.BlockSpec((tk, kd2), lambda i, k: (k, 0)),        # fused XW (mu|lv)
            pl.BlockSpec((tm, tk), lambda i, k: (i, k)),         # A_hat tile
            pl.BlockSpec((1, kd2), lambda i, k: (0, 0)),         # fused bias
            pl.BlockSpec((1, kd2), lambda i, k: (0, 0)),         # fused PReLU alphas
            pl.BlockSpec((tm, kd), lambda i, k: (i, 0)),         # eps row tile
            pl.BlockSpec((kd, k_heads), lambda i, k: (0, 0)),    # block-diag W_r (bf16)
            pl.BlockSpec((1, k_heads), lambda i, k: (0, 0)),     # b_r
        ],
        out_specs=pl.BlockSpec((tm, out_w), lambda i, k: (i, 0)),
        scratch_shapes=[pltpu.VMEM((tm, kd2), jnp.float32)],
        compiler_params=pltpu.CompilerParams(
            dimension_semantics=("parallel", "arbitrary"),
            vmem_limit_bytes=_VMEM_LIMIT),
        cost_estimate=pl.CostEstimate(flops=flops,
                                      transcendentals=transcendentals,
                                      bytes_accessed=bytes_accessed),
    )(xw_heads.astype(MATMUL_DTYPE), a_hat_bf16,
      b_all.astype(jnp.float32), alpha_all.astype(jnp.float32),
      eps_flat.astype(jnp.float32),
      wr_bd.astype(MATMUL_DTYPE), b_r.astype(jnp.float32))


# ----------------------------------------------------------------------------
# Plain-JAX glue: dense normalized adjacency, deterministic parameter init.
# ----------------------------------------------------------------------------
def build_a_hat(edge_index, n):
    """A_hat = D^-1/2 (A + I) D^-1/2, matching PyG gcn_norm (edges scatter-add)."""
    src, dst = edge_index[0], edge_index[1]
    a = jnp.zeros((n, n), jnp.float32)
    a = a.at[dst, src].add(1.0)                        # message j -> i (duplicates sum)
    a = a + jnp.eye(n, dtype=jnp.float32)              # appended self loops
    deg = a.sum(axis=1)
    dinv = 1.0 / jnp.sqrt(deg)
    return (dinv[:, None] * a) * dinv[None, :]


def init_params(key, input_dim, hidden_channels_list, output_dim, k_heads):
    params = {"hgcn": [], "heads": []}
    chans = [input_dim] + list(hidden_channels_list)
    for i in range(len(hidden_channels_list)):
        key, kw = jax.random.split(key)
        w = jax.random.normal(kw, (chans[i], chans[i + 1]), jnp.float32) * 0.1
        b = jnp.zeros((chans[i + 1],), jnp.float32)
        alpha = jnp.array([0.25], jnp.float32)          # PReLU init (torch default)
        params["hgcn"].append((w, b, alpha))
    h_last = hidden_channels_list[-1]
    for _ in range(k_heads):
        key, k1, k2, k3 = jax.random.split(key, 4)
        params["heads"].append(dict(
            w_mu=jax.random.normal(k1, (h_last, output_dim), jnp.float32) * 0.1,
            b_mu=jnp.zeros((output_dim,), jnp.float32),
            a_mu=jnp.array([0.25], jnp.float32),
            w_lv=jax.random.normal(k2, (h_last, output_dim), jnp.float32) * 0.1,
            b_lv=jnp.zeros((output_dim,), jnp.float32),
            a_lv=jnp.array([0.25], jnp.float32),
            w_r=jax.random.normal(k3, (output_dim, 1), jnp.float32) * 0.1,
            b_r=jnp.zeros((1,), jnp.float32)))
    return params


def ocdib_forward(params, x, a_hat, eps_all):
    n = x.shape[0]
    k_heads, _, d = eps_all.shape
    kd = k_heads * d
    n_pad, tm, tk = _tiles_for(n)

    # Pad the node axis once (zero rows/cols are inert through A_hat), cast A once.
    a_pad = jnp.zeros((n_pad, n_pad), jnp.float32).at[:n, :n].set(a_hat)
    a_pad = a_pad.astype(MATMUL_DTYPE)
    h = jnp.zeros((n_pad, x.shape[1]), jnp.float32).at[:n, :].set(x)
    h = h.astype(MATMUL_DTYPE)

    # hgcn trunk: stacked GCNConv + PReLU.  X @ W is computed ONCE per layer
    # (plain-XLA bf16 matmul, f32 accumulate); the Pallas kernel streams A_hat
    # against the cached XW.  Intermediate layers emit bf16, the last emits f32.
    n_layers = len(params["hgcn"])
    for li, (w, b, alpha) in enumerate(params["hgcn"]):
        xw = jnp.dot(h, w.astype(MATMUL_DTYPE),
                     preferred_element_type=jnp.float32)          # (Np, Fout) f32
        last = li == n_layers - 1
        h = a_sweep_prelu(a_pad, xw, b, alpha, tm=tm, tk=tk,
                          out_dtype=jnp.float32 if last else MATMUL_DTYPE)
    hgcn_pad = h                                                  # (Np, H) f32

    # Concatenate all K heads' parameters: [W_mu_0..W_mu_{K-1} | W_lv_0..W_lv_{K-1}].
    heads = params["heads"]
    w_all = jnp.concatenate([hp["w_mu"] for hp in heads]
                            + [hp["w_lv"] for hp in heads], axis=1)        # (H, 2*K*D)
    b_all = jnp.concatenate([hp["b_mu"] for hp in heads]
                            + [hp["b_lv"] for hp in heads]).reshape(1, 2 * kd)
    alpha_all = jnp.concatenate(
        [jnp.repeat(hp["a_mu"], d) for hp in heads]
        + [jnp.repeat(hp["a_lv"], d) for hp in heads]).reshape(1, 2 * kd)
    b_r = jnp.concatenate([hp["b_r"] for hp in heads]).reshape(1, k_heads)

    # Block-diagonal (K*D, K) matrix batching the K Linear(D, 1) "r" heads.
    wr_bd = jnp.zeros((kd, k_heads), jnp.float32)
    for k in range(k_heads):
        wr_bd = wr_bd.at[k * d:(k + 1) * d, k].set(heads[k]["w_r"][:, 0])

    # eps: (K, N, D) -> (Np, K*D), column layout matching mu/logvar/hk.
    eps_flat = jnp.transpose(eps_all, (1, 0, 2)).reshape(n, kd)
    eps_pad = jnp.zeros((n_pad, kd), jnp.float32).at[:n, :].set(eps_flat)

    # Shared first matmul for all heads, computed once (not per row tile).
    xw_heads = jnp.dot(hgcn_pad.astype(MATMUL_DTYPE), w_all.astype(MATMUL_DTYPE),
                       preferred_element_type=jnp.float32)        # (Np, 2*K*D) f32

    slab = heads_fused(a_pad, xw_heads, b_all, alpha_all, eps_pad, wr_bd, b_r,
                       tm=tm, tk=tk)                              # (Np, 128k) lane-dense

    mu = slab[:n, 0 * kd:1 * kd]
    logvar = slab[:n, 1 * kd:2 * kd]
    hk = slab[:n, 2 * kd:3 * kd]
    r = slab[:n, 3 * kd:3 * kd + k_heads]
    return (hgcn_pad[:n], logvar, mu, hk, r)


if __name__ == "__main__":
    # Small config consistent with the module's __init__/forward.
    N = 8                      # number of graph nodes
    INPUT_DIM = 16
    HIDDEN = [32, 32]
    OUTPUT_DIM = 8
    K = 3

    key = jax.random.PRNGKey(0)
    key, kx, keps = jax.random.split(key, 3)

    x = jax.random.normal(kx, (N, INPUT_DIM), jnp.float32)

    # Undirected ring graph (both directions) -> edge_index of shape (2, 2N).
    src = jnp.concatenate([jnp.arange(N), (jnp.arange(N) + 1) % N])
    dst = jnp.concatenate([(jnp.arange(N) + 1) % N, jnp.arange(N)])
    edge_index = jnp.stack([src, dst]).astype(jnp.int32)

    a_hat = build_a_hat(edge_index, N)
    params = init_params(key, INPUT_DIM, HIDDEN, OUTPUT_DIM, K)

    # Deterministic reparameterization noise (torch.randn_like equivalent).
    eps_all = jax.random.normal(keps, (K, N, OUTPUT_DIM), jnp.float32)

    fwd = jax.jit(ocdib_forward)
    hgcn, logvar, mu, hk, r = fwd(params, x, a_hat, eps_all)
    jax.block_until_ready((hgcn, logvar, mu, hk, r))

    assert hgcn.shape == (N, HIDDEN[-1])
    assert logvar.shape == (N, K * OUTPUT_DIM)
    assert mu.shape == (N, K * OUTPUT_DIM)
    assert hk.shape == (N, K * OUTPUT_DIM)
    assert r.shape == (N, K)
    print("KERNEL_OK")
</pallas_src>

<mosaic_0001>
module attributes {stable_mosaic.version = 11 : i64} {
  func.func @_a_sweep_prelu_kernel(%arg0: i32, %arg1: i32, %arg2: memref<128x32xbf16, #tpu.memory_space<vmem>>, %arg3: memref<128x128xbf16, #tpu.memory_space<vmem>>, %arg4: memref<1x32xf32, #tpu.memory_space<vmem>>, %arg5: memref<1xf32, #tpu.memory_space<smem>>, %arg6: memref<128x32xbf16, #tpu.memory_space<vmem>>, %arg7: memref<128x32xf32, #tpu.memory_space<vmem>>) attributes {dimension_semantics = [#tpu.dimension_semantics<parallel>, #tpu.dimension_semantics<arbitrary>], iteration_bounds = array<i64: 1, 1>, scalar_prefetch = 0 : i64, scratch_operands = 1 : i64, tpu.core_type = #tpu.core_type<tc>, window_params = [{transform_indices = @transform_0, window_bounds = array<i64: 128, 32>}, {transform_indices = @transform_1, window_bounds = array<i64: 128, 128>}, {pipeline_mode = #tpu.pipeline_mode<synchronous>, transform_indices = @transform_2, window_bounds = array<i64: 1, 32>}, {transform_indices = @transform_3, window_bounds = array<i64: 1>}, {transform_indices = @transform_4, window_bounds = array<i64: 128, 32>}]} {
    %c0_i32 = arith.constant 0 : i32
    %0 = arith.cmpi eq, %arg1, %c0_i32 : i32
    %1 = arith.extui %0 : i1 to i32
    %c0_i32_0 = arith.constant 0 : i32
    %2 = arith.cmpi ne, %1, %c0_i32_0 : i32
    scf.if %2 {
      %cst_10 = arith.constant 0.000000e+00 : f32
      %12 = vector.broadcast %cst_10 : f32 to vector<128x32xf32>
      %c0_11 = arith.constant 0 : index
      %c0_12 = arith.constant 0 : index
      %13 = vector.load %arg7[%c0_11, %c0_12] : memref<128x32xf32, #tpu.memory_space<vmem>>, vector<128x32xf32>
      tpu.vector_store %arg7[%c0_11, %c0_12], %12 {strides = array<i32>} : memref<128x32xf32, #tpu.memory_space<vmem>>, vector<128x32xf32>,
    } else {
    }
    %c0 = arith.constant 0 : index
    %c0_1 = arith.constant 0 : index
    %3 = vector.load %arg7[%c0, %c0_1] : memref<128x32xf32, #tpu.memory_space<vmem>>, vector<128x32xf32>
    %c0_2 = arith.constant 0 : index
    %c0_3 = arith.constant 0 : index
    %4 = vector.load %arg3[%c0_2, %c0_3] : memref<128x128xbf16, #tpu.memory_space<vmem>>, vector<128x128xbf16>
    %c0_4 = arith.constant 0 : index
    %c0_5 = arith.constant 0 : index
    %5 = vector.load %arg2[%c0_4, %c0_5] : memref<128x32xbf16, #tpu.memory_space<vmem>>, vector<128x32xbf16>
    %cst = arith.constant dense<0.000000e+00> : vector<128x32xf32>
    %6 = tpu.matmul %4, %5, %cst {dimension_numbers = #tpu.dot_dimension_numbers<[1], [0], [0], [1], [0, 0, 1, 1], [], []>} : vector<128x128xbf16>, vector<128x32xbf16>, vector<128x32xf32> -> vector<128x32xf32>
    %7 = arith.addf %3, %6 : vector<128x32xf32>
    %c0_6 = arith.constant 0 : index
    %c0_7 = arith.constant 0 : index
    %8 = vector.load %arg7[%c0_6, %c0_7] : memref<128x32xf32, #tpu.memory_space<vmem>>, vector<128x32xf32>
    tpu.vector_store %arg7[%c0_6, %c0_7], %7 {strides = array<i32>} : memref<128x32xf32, #tpu.memory_space<vmem>>, vector<128x32xf32>,
    %c0_i32_8 = arith.constant 0 : i32
    %9 = arith.cmpi eq, %arg1, %c0_i32_8 : i32
    %10 = arith.extui %9 : i1 to i32
    %c0_i32_9 = arith.constant 0 : i32
    %11 = arith.cmpi ne, %10, %c0_i32_9 : i32
    scf.if %11 {
      %c0_10 = arith.constant 0 : index
      %c0_11 = arith.constant 0 : index
      %12 = vector.load %arg7[%c0_10, %c0_11] : memref<128x32xf32, #tpu.memory_space<vmem>>, vector<128x32xf32>
      %c0_12 = arith.constant 0 : index
      %c0_13 = arith.constant 0 : index
      %13 = vector.load %arg4[%c0_12, %c0_13] : memref<1x32xf32, #tpu.memory_space<vmem>>, vector<1x32xf32>
      %14 = vector.broadcast %13 : vector<1x32xf32> to vector<128x32xf32>
      %15 = arith.addf %12, %14 : vector<128x32xf32>
      %c0_14 = arith.constant 0 : index
      %16 = memref.load %arg5[%c0_14] : memref<1xf32, #tpu.memory_space<smem>>
      %cst_15 = arith.constant 0.000000e+00 : f32
      %17 = vector.broadcast %cst_15 : f32 to vector<128x32xf32>
      %18 = arith.cmpf oge, %15, %17 : vector<128x32xf32>
      %19 = vector.broadcast %16 : f32 to vector<128x32xf32>
      %20 = arith.mulf %19, %15 : vector<128x32xf32>
      %21 = arith.select %18, %15, %20 : vector<128x32xi1>, vector<128x32xf32>
      %22 = arith.truncf %21 : vector<128x32xf32> to vector<128x32xbf16>
      %c0_16 = arith.constant 0 : index
      %c0_17 = arith.constant 0 : index
      %23 = vector.load %arg6[%c0_16, %c0_17] : memref<128x32xbf16, #tpu.memory_space<vmem>>, vector<128x32xbf16>
      tpu.vector_store %arg6[%c0_16, %c0_17], %22 {strides = array<i32>} : memref<128x32xbf16, #tpu.memory_space<vmem>>, vector<128x32xbf16>,
    } else {
    }
    return
  }
  func.func @transform_0(%arg0: i32, %arg1: i32) -> (i32, i32) {
    %c0_i32 = arith.constant 0 : i32
    %c0_i32_0 = arith.constant 0 : i32
    return %arg1, %c0_i32 : i32, i32
  }
  func.func @transform_1(%arg0: i32, %arg1: i32) -> (i32, i32) {
    %c0_i32 = arith.constant 0 : i32
    return %arg0, %arg1 : i32, i32
  }
  func.func @transform_2(%arg0: i32, %arg1: i32) -> (i32, i32) {
    %c0_i32 = arith.constant 0 : i32
    %c0_i32_0 = arith.constant 0 : i32
    %c0_i32_1 = arith.constant 0 : i32
    return %c0_i32, %c0_i32_0 : i32, i32
  }
  func.func @transform_3(%arg0: i32, %arg1: i32) -> i32 {
    %c0_i32 = arith.constant 0 : i32
    %c0_i32_0 = arith.constant 0 : i32
    return %c0_i32 : i32
  }
  func.func @transform_4(%arg0: i32, %arg1: i32) -> (i32, i32) {
    %c0_i32 = arith.constant 0 : i32
    %c0_i32_0 = arith.constant 0 : i32
    return %arg0, %c0_i32 : i32, i32
  }
}

module attributes {stable_mosaic.version = 11 : i64} {
  func.func @_a_sweep_prelu_kernel(%arg0: i32, %arg1: i32, %arg2: memref<128x32xbf16, #tpu.memory_space<vmem>>, %arg3: memref<128x128xbf16, #tpu.memory_space<vmem>>, %arg4: memref<1x32xf32, #tpu.memory_space<vmem>>, %arg5: memref<1xf32, #tpu.memory_space<smem>>, %arg6: memref<128x32xf32, #tpu.memory_space<vmem>>, %arg7: memref<128x32xf32, #tpu.memory_space<vmem>>) attributes {dimension_semantics = [#tpu.dimension_semantics<parallel>, #tpu.dimension_semantics<arbitrary>], iteration_bounds = array<i64: 1, 1>, scalar_prefetch = 0 : i64, scratch_operands = 1 : i64, tpu.core_type = #tpu.core_type<tc>, window_params = [{transform_indices = @transform_0, window_bounds = array<i64: 128, 32>}, {transform_indices = @transform_1, window_bounds = array<i64: 128, 128>}, {pipeline_mode = #tpu.pipeline_mode<synchronous>, transform_indices = @transform_2, window_bounds = array<i64: 1, 32>}, {transform_indices = @transform_3, window_bounds = array<i64: 1>}, {transform_indices = @transform_4, window_bounds = array<i64: 128, 32>}]} {
    %c0_i32 = arith.constant 0 : i32
    %0 = arith.cmpi eq, %arg1, %c0_i32 : i32
    %1 = arith.extui %0 : i1 to i32
    %c0_i32_0 = arith.constant 0 : i32
    %2 = arith.cmpi ne, %1, %c0_i32_0 : i32
    scf.if %2 {
      %cst_10 = arith.constant 0.000000e+00 : f32
      %12 = vector.broadcast %cst_10 : f32 to vector<128x32xf32>
      %c0_11 = arith.constant 0 : index
      %c0_12 = arith.constant 0 : index
      %13 = vector.load %arg7[%c0_11, %c0_12] : memref<128x32xf32, #tpu.memory_space<vmem>>, vector<128x32xf32>
      tpu.vector_store %arg7[%c0_11, %c0_12], %12 {strides = array<i32>} : memref<128x32xf32, #tpu.memory_space<vmem>>, vector<128x32xf32>,
    } else {
    }
    %c0 = arith.constant 0 : index
    %c0_1 = arith.constant 0 : index
    %3 = vector.load %arg7[%c0, %c0_1] : memref<128x32xf32, #tpu.memory_space<vmem>>, vector<128x32xf32>
    %c0_2 = arith.constant 0 : index
    %c0_3 = arith.constant 0 : index
    %4 = vector.load %arg3[%c0_2, %c0_3] : memref<128x128xbf16, #tpu.memory_space<vmem>>, vector<128x128xbf16>
    %c0_4 = arith.constant 0 : index
    %c0_5 = arith.constant 0 : index
    %5 = vector.load %arg2[%c0_4, %c0_5] : memref<128x32xbf16, #tpu.memory_space<vmem>>, vector<128x32xbf16>
    %cst = arith.constant dense<0.000000e+00> : vector<128x32xf32>
    %6 = tpu.matmul %4, %5, %cst {dimension_numbers = #tpu.dot_dimension_numbers<[1], [0], [0], [1], [0, 0, 1, 1], [], []>} : vector<128x128xbf16>, vector<128x32xbf16>, vector<128x32xf32> -> vector<128x32xf32>
    %7 = arith.addf %3, %6 : vector<128x32xf32>
    %c0_6 = arith.constant 0 : index
    %c0_7 = arith.constant 0 : index
    %8 = vector.load %arg7[%c0_6, %c0_7] : memref<128x32xf32, #tpu.memory_space<vmem>>, vector<128x32xf32>
    tpu.vector_store %arg7[%c0_6, %c0_7], %7 {strides = array<i32>} : memref<128x32xf32, #tpu.memory_space<vmem>>, vector<128x32xf32>,
    %c0_i32_8 = arith.constant 0 : i32
    %9 = arith.cmpi eq, %arg1, %c0_i32_8 : i32
    %10 = arith.extui %9 : i1 to i32
    %c0_i32_9 = arith.constant 0 : i32
    %11 = arith.cmpi ne, %10, %c0_i32_9 : i32
    scf.if %11 {
      %c0_10 = arith.constant 0 : index
      %c0_11 = arith.constant 0 : index
      %12 = vector.load %arg7[%c0_10, %c0_11] : memref<128x32xf32, #tpu.memory_space<vmem>>, vector<128x32xf32>
      %c0_12 = arith.constant 0 : index
      %c0_13 = arith.constant 0 : index
      %13 = vector.load %arg4[%c0_12, %c0_13] : memref<1x32xf32, #tpu.memory_space<vmem>>, vector<1x32xf32>
      %14 = vector.broadcast %13 : vector<1x32xf32> to vector<128x32xf32>
      %15 = arith.addf %12, %14 : vector<128x32xf32>
      %c0_14 = arith.constant 0 : index
      %16 = memref.load %arg5[%c0_14] : memref<1xf32, #tpu.memory_space<smem>>
      %cst_15 = arith.constant 0.000000e+00 : f32
      %17 = vector.broadcast %cst_15 : f32 to vector<128x32xf32>
      %18 = arith.cmpf oge, %15, %17 : vector<128x32xf32>
      %19 = vector.broadcast %16 : f32 to vector<128x32xf32>
      %20 = arith.mulf %19, %15 : vector<128x32xf32>
      %21 = arith.select %18, %15, %20 : vector<128x32xi1>, vector<128x32xf32>
      %c0_16 = arith.constant 0 : index
      %c0_17 = arith.constant 0 : index
      %22 = vector.load %arg6[%c0_16, %c0_17] : memref<128x32xf32, #tpu.memory_space<vmem>>, vector<128x32xf32>
      tpu.vector_store %arg6[%c0_16, %c0_17], %21 {strides = array<i32>} : memref<128x32xf32, #tpu.memory_space<vmem>>, vector<128x32xf32>,
    } else {
    }
    return
  }
  func.func @transform_0(%arg0: i32, %arg1: i32) -> (i32, i32) {
    %c0_i32 = arith.constant 0 : i32
    %c0_i32_0 = arith.constant 0 : i32
    return %arg1, %c0_i32 : i32, i32
  }
  func.func @transform_1(%arg0: i32, %arg1: i32) -> (i32, i32) {
    %c0_i32 = arith.constant 0 : i32
    return %arg0, %arg1 : i32, i32
  }
  func.func @transform_2(%arg0: i32, %arg1: i32) -> (i32, i32) {
    %c0_i32 = arith.constant 0 : i32
    %c0_i32_0 = arith.constant 0 : i32
    %c0_i32_1 = arith.constant 0 : i32
    return %c0_i32, %c0_i32_0 : i32, i32
  }
  func.func @transform_3(%arg0: i32, %arg1: i32) -> i32 {
    %c0_i32 = arith.constant 0 : i32
    %c0_i32_0 = arith.constant 0 : i32
    return %c0_i32 : i32
  }
  func.func @transform_4(%arg0: i32, %arg1: i32) -> (i32, i32) {
    %c0_i32 = arith.constant 0 : i32
    %c0_i32_0 = arith.constant 0 : i32
    return %arg0, %c0_i32 : i32, i32
  }
}

module attributes {stable_mosaic.version = 11 : i64} {
  func.func @_heads_kernel(%arg0: i32, %arg1: i32, %arg2: memref<128x48xbf16, #tpu.memory_space<vmem>>, %arg3: memref<128x128xbf16, #tpu.memory_space<vmem>>, %arg4: memref<1x48xf32, #tpu.memory_space<vmem>>, %arg5: memref<1x48xf32, #tpu.memory_space<vmem>>, %arg6: memref<128x24xf32, #tpu.memory_space<vmem>>, %arg7: memref<24x3xbf16, #tpu.memory_space<vmem>>, %arg8: memref<1x3xf32, #tpu.memory_space<vmem>>, %arg9: memref<128x128xf32, #tpu.memory_space<vmem>>, %arg10: memref<128x48xf32, #tpu.memory_space<vmem>>) attributes {dimension_semantics = [#tpu.dimension_semantics<parallel>, #tpu.dimension_semantics<arbitrary>], iteration_bounds = array<i64: 1, 1>, scalar_prefetch = 0 : i64, scratch_operands = 1 : i64, tpu.core_type = #tpu.core_type<tc>, window_params = [{transform_indices = @transform_0, window_bounds = array<i64: 128, 48>}, {transform_indices = @transform_1, window_bounds = array<i64: 128, 128>}, {pipeline_mode = #tpu.pipeline_mode<synchronous>, transform_indices = @transform_2, window_bounds = array<i64: 1, 48>}, {pipeline_mode = #tpu.pipeline_mode<synchronous>, transform_indices = @transform_3, window_bounds = array<i64: 1, 48>}, {transform_indices = @transform_4, window_bounds = array<i64: 128, 24>}, {pipeline_mode = #tpu.pipeline_mode<synchronous>, transform_indices = @transform_5, window_bounds = array<i64: 24, 3>}, {pipeline_mode = #tpu.pipeline_mode<synchronous>, transform_indices = @transform_6, window_bounds = array<i64: 1, 3>}, {transform_indices = @transform_7, window_bounds = array<i64: 128, 128>}]} {
    %c0_i32 = arith.constant 0 : i32
    %0 = arith.cmpi eq, %arg1, %c0_i32 : i32
    %1 = arith.extui %0 : i1 to i32
    %c0_i32_0 = arith.constant 0 : i32
    %2 = arith.cmpi ne, %1, %c0_i32_0 : i32
    scf.if %2 {
      %cst_10 = arith.constant 0.000000e+00 : f32
      %12 = vector.broadcast %cst_10 : f32 to vector<128x48xf32>
      %c0_11 = arith.constant 0 : index
      %c0_12 = arith.constant 0 : index
      %13 = vector.load %arg10[%c0_11, %c0_12] : memref<128x48xf32, #tpu.memory_space<vmem>>, vector<128x48xf32>
      tpu.vector_store %arg10[%c0_11, %c0_12], %12 {strides = array<i32>} : memref<128x48xf32, #tpu.memory_space<vmem>>, vector<128x48xf32>,
    } else {
    }
    %c0 = arith.constant 0 : index
    %c0_1 = arith.constant 0 : index
    %3 = vector.load %arg10[%c0, %c0_1] : memref<128x48xf32, #tpu.memory_space<vmem>>, vector<128x48xf32>
    %c0_2 = arith.constant 0 : index
    %c0_3 = arith.constant 0 : index
    %4 = vector.load %arg3[%c0_2, %c0_3] : memref<128x128xbf16, #tpu.memory_space<vmem>>, vector<128x128xbf16>
    %c0_4 = arith.constant 0 : index
    %c0_5 = arith.constant 0 : index
    %5 = vector.load %arg2[%c0_4, %c0_5] : memref<128x48xbf16, #tpu.memory_space<vmem>>, vector<128x48xbf16>
    %cst = arith.constant dense<0.000000e+00> : vector<128x48xf32>
    %6 = tpu.matmul %4, %5, %cst {dimension_numbers = #tpu.dot_dimension_numbers<[1], [0], [0], [1], [0, 0, 1, 1], [], []>} : vector<128x128xbf16>, vector<128x48xbf16>, vector<128x48xf32> -> vector<128x48xf32>
    %7 = arith.addf %3, %6 : vector<128x48xf32>
    %c0_6 = arith.constant 0 : index
    %c0_7 = arith.constant 0 : index
    %8 = vector.load %arg10[%c0_6, %c0_7] : memref<128x48xf32, #tpu.memory_space<vmem>>, vector<128x48xf32>
    tpu.vector_store %arg10[%c0_6, %c0_7], %7 {strides = array<i32>} : memref<128x48xf32, #tpu.memory_space<vmem>>, vector<128x48xf32>,
    %c0_i32_8 = arith.constant 0 : i32
    %9 = arith.cmpi eq, %arg1, %c0_i32_8 : i32
    %10 = arith.extui %9 : i1 to i32
    %c0_i32_9 = arith.constant 0 : i32
    %11 = arith.cmpi ne, %10, %c0_i32_9 : i32
    scf.if %11 {
      %c0_10 = arith.constant 0 : index
      %c0_11 = arith.constant 0 : index
      %12 = vector.load %arg10[%c0_10, %c0_11] : memref<128x48xf32, #tpu.memory_space<vmem>>, vector<128x48xf32>
      %c0_12 = arith.constant 0 : index
      %c0_13 = arith.constant 0 : index
      %13 = vector.load %arg4[%c0_12, %c0_13] : memref<1x48xf32, #tpu.memory_space<vmem>>, vector<1x48xf32>
      %14 = vector.broadcast %13 : vector<1x48xf32> to vector<128x48xf32>
      %15 = arith.addf %12, %14 : vector<128x48xf32>
      %cst_14 = arith.constant 0.000000e+00 : f32
      %16 = vector.broadcast %cst_14 : f32 to vector<128x48xf32>
      %17 = arith.cmpf oge, %15, %16 : vector<128x48xf32>
      %c0_15 = arith.constant 0 : index
      %c0_16 = arith.constant 0 : index
      %18 = vector.load %arg5[%c0_15, %c0_16] : memref<1x48xf32, #tpu.memory_space<vmem>>, vector<1x48xf32>
      %19 = vector.broadcast %18 : vector<1x48xf32> to vector<128x48xf32>
      %20 = arith.mulf %19, %15 : vector<128x48xf32>
      %21 = arith.select %17, %15, %20 : vector<128x48xi1>, vector<128x48xf32>
      %22 = vector.extract_strided_slice %21 {offsets = [0, 0], sizes = [128, 24], strides = [1, 1]} : vector<128x48xf32> to vector<128x24xf32>
      %23 = vector.extract_strided_slice %21 {offsets = [0, 24], sizes = [128, 24], strides = [1, 1]} : vector<128x48xf32> to vector<128x24xf32>
      %24 = arith.negf %23 : vector<128x24xf32>
      %25 = math.exp %24 : vector<128x24xf32>
      %cst_17 = arith.constant 1.000000e+00 : f32
      %26 = vector.broadcast %cst_17 : f32 to vector<128x24xf32>
      %27 = arith.addf %26, %25 : vector<128x24xf32>
      %28 = arith.divf %26, %27 : vector<128x24xf32>
      %c0_18 = arith.constant 0 : index
      %c0_19 = arith.constant 0 : index
      %29 = vector.load %arg6[%c0_18, %c0_19] : memref<128x24xf32, #tpu.memory_space<vmem>>, vector<128x24xf32>
      %cst_20 = arith.constant 5.000000e-01 : f32
      %30 = vector.broadcast %cst_20 : f32 to vector<128x24xf32>
      %31 = arith.mulf %30, %28 : vector<128x24xf32>
      %32 = math.exp %31 : vector<128x24xf32>
      %33 = arith.mulf %29, %32 : vector<128x24xf32>
      %34 = arith.addf %33, %22 : vector<128x24xf32>
      %35 = arith.truncf %34 : vector<128x24xf32> to vector<128x24xbf16>
      %c0_21 = arith.constant 0 : index
      %c0_22 = arith.constant 0 : index
      %36 = vector.load %arg7[%c0_21, %c0_22] : memref<24x3xbf16, #tpu.memory_space<vmem>>, vector<24x3xbf16>
      %cst_23 = arith.constant dense<0.000000e+00> : vector<128x3xf32>
      %37 = tpu.matmul %35, %36, %cst_23 {dimension_numbers = #tpu.dot_dimension_numbers<[1], [0], [0], [1], [0, 0, 1, 1], [], []>} : vector<128x24xbf16>, vector<24x3xbf16>, vector<128x3xf32> -> vector<128x3xf32>
      %c0_24 = arith.constant 0 : index
      %c0_25 = arith.constant 0 : index
      %38 = vector.load %arg8[%c0_24, %c0_25] : memref<1x3xf32, #tpu.memory_space<vmem>>, vector<1x3xf32>
      %39 = vector.broadcast %38 : vector<1x3xf32> to vector<128x3xf32>
      %40 = arith.addf %37, %39 : vector<128x3xf32>
      %41 = arith.negf %40 : vector<128x3xf32>
      %42 = math.exp %41 : vector<128x3xf32>
      %cst_26 = arith.constant 1.000000e+00 : f32
      %43 = vector.broadcast %cst_26 : f32 to vector<128x3xf32>
      %44 = arith.addf %43, %42 : vector<128x3xf32>
      %45 = arith.divf %43, %44 : vector<128x3xf32>
      %46 = tpu.concatenate %22, %28, %34, %45 in 1 : vector<128x24xf32>, vector<128x24xf32>, vector<128x24xf32>, vector<128x3xf32> -> vector<128x75xf32>
      %cst_27 = arith.constant 0.000000e+00 : f32
      %47 = vector.broadcast %cst_27 : f32 to vector<128x53xf32>
      %48 = tpu.concatenate %46, %47 in 1 : vector<128x75xf32>, vector<128x53xf32> -> vector<128x128xf32>
      %c0_28 = arith.constant 0 : index
      %c0_29 = arith.constant 0 : index
      %49 = vector.load %arg9[%c0_28, %c0_29] : memref<128x128xf32, #tpu.memory_space<vmem>>, vector<128x128xf32>
      tpu.vector_store %arg9[%c0_28, %c0_29], %48 {strides = array<i32>} : memref<128x128xf32, #tpu.memory_space<vmem>>, vector<128x128xf32>,
    } else {
    }
    return
  }
  func.func @transform_0(%arg0: i32, %arg1: i32) -> (i32, i32) {
    %c0_i32 = arith.constant 0 : i32
    %c0_i32_0 = arith.constant 0 : i32
    return %arg1, %c0_i32 : i32, i32
  }
  func.func @transform_1(%arg0: i32, %arg1: i32) -> (i32, i32) {
    %c0_i32 = arith.constant 0 : i32
    return %arg0, %arg1 : i32, i32
  }
  func.func @transform_2(%arg0: i32, %arg1: i32) -> (i32, i32) {
    %c0_i32 = arith.constant 0 : i32
    %c0_i32_0 = arith.constant 0 : i32
    %c0_i32_1 = arith.constant 0 : i32
    return %c0_i32, %c0_i32_0 : i32, i32
  }
  func.func @transform_3(%arg0: i32, %arg1: i32) -> (i32, i32) {
    %c0_i32 = arith.constant 0 : i32
    %c0_i32_0 = arith.constant 0 : i32
    %c0_i32_1 = arith.constant 0 : i32
    return %c0_i32, %c0_i32_0 : i32, i32
  }
  func.func @transform_4(%arg0: i32, %arg1: i32) -> (i32, i32) {
    %c0_i32 = arith.constant 0 : i32
    %c0_i32_0 = arith.constant 0 : i32
    return %arg0, %c0_i32 : i32, i32
  }
  func.func @transform_5(%arg0: i32, %arg1: i32) -> (i32, i32) {
    %c0_i32 = arith.constant 0 : i32
    %c0_i32_0 = arith.constant 0 : i32
    %c0_i32_1 = arith.constant 0 : i32
    return %c0_i32, %c0_i32_0 : i32, i32
  }
  func.func @transform_6(%arg0: i32, %arg1: i32) -> (i32, i32) {
    %c0_i32 = arith.constant 0 : i32
    %c0_i32_0 = arith.constant 0 : i32
    %c0_i32_1 = arith.constant 0 : i32
    return %c0_i32, %c0_i32_0 : i32, i32
  }
  func.func @transform_7(%arg0: i32, %arg1: i32) -> (i32, i32) {
    %c0_i32 = arith.constant 0 : i32
    %c0_i32_0 = arith.constant 0 : i32
    return %arg0, %c0_i32 : i32, i32
  }
}

</mosaic_0001>

<bundles_post_ra>
// kernel: ocdib_forward.3
= control target key start
LH: loop header
LB: loop body
LE: loop exit
PB: predicated region body
PF: predicated region fallthrough
CT: control target
= control target key end

     0   :  { %vm23_vm0 = vcmask 261120   ;;  %v621_v1 = vmov 0.0   ;;  %vm470_vm1 = vcmask 257024   ;;  %s834_s0 = inlined_call_operand.vmem [shape: bf16[128,32], index: 0, kind: input, shape index: {}]   ;;  %s835_s1 = inlined_call_operand.vmem [shape: bf16[128,128], index: 1, kind: input, shape index: {}]   ;;  %s836_s2 = inlined_call_operand.vmem [shape: f32[1,32], index: 2, kind: input, shape index: {}]   ;;  %s837_s3 = inlined_call_operand.<no memory space> [shape: f32[1], index: 3, kind: input, shape index: {}]   ;;  %s838_s4 = inlined_call_operand.vmem [shape: bf16[128,32], index: 4, kind: output, shape index: {}]  }
   0x1   :  { %v605_v0 = vld [vmem:[%s834_s0 + $0x38] sm:$0xff]   ;;  %26 = vst.msk [vmem:[#allocation2 + $0x10] sm:$0xff] %vm23_vm0, %v621_v1  ;;  %24 = vst.msk [vmem:[#allocation2] sm:$0xff] %vm23_vm0, %v621_v1  ;;  %v606_v2 = vld [vmem:[%s834_s0 + $0x30] sm:$0xff]   ;;  %v727_v51 = vstv %s837_s3 }
   0x2   :  { %25 = vst.msk [vmem:[#allocation2 + $0x8] sm:$0xff] %vm23_vm0, %v621_v1  ;;  %27 = vst.msk [vmem:[#allocation2 + $0x18] sm:$0xff] %vm23_vm0, %v621_v1  ;;  %556 = vmatprep.subr.bf16.mxu0 %v605_v0  ;;  %588 = vmatprep.subr.bf16.mxu1 %v605_v0  ;;  %v607_v3 = vld [vmem:[%s834_s0 + $0x28] sm:$0xff]   ;;  %v608_v4 = vld [vmem:[%s834_s0 + $0x20] sm:$0xff]  }
   0x3   :  { %28 = vst.msk [vmem:[#allocation2 + $0x20] sm:$0xff] %vm23_vm0, %v621_v1  ;;  %29 = vst.msk [vmem:[#allocation2 + $0x28] sm:$0xff] %vm23_vm0, %v621_v1  ;;  %557 = vmatpush3.bf16.msra.mxu0 %v605_v0  ;;  %596 = vmatpush3.bf16.msra.mxu1 %v605_v0  ;;  %v613_v5 = vld [vmem:[%s835_s1] sm:$0xff]   ;;  %v609_v7 = vld [vmem:[%s834_s0 + $0x18] sm:$0xff]  }
   0x4   :  { %30 = vst.msk [vmem:[#allocation2 + $0x30] sm:$0xff] %vm23_vm0, %v621_v1  ;;  %31 = vst.msk [vmem:[#allocation2 + $0x38] sm:$0xff] %vm23_vm0, %v621_v1  ;;  %558 = vmatprep.subr.bf16.mxu0 %v606_v2  ;;  %589 = vmatprep.subr.bf16.mxu1 %v606_v2  ;;  %v614_v6 = vld [vmem:[%s835_s1 + $0x20] sm:$0xff]   ;;  %v610_v8 = vld [vmem:[%s834_s0 + $0x10] sm:$0xff]  }
   0x5   :  { %32 = vst.msk [vmem:[#allocation2 + $0x40] sm:$0xff] %vm23_vm0, %v621_v1  ;;  %33 = vst.msk [vmem:[#allocation2 + $0x48] sm:$0xff] %vm23_vm0, %v621_v1  ;;  %572 = vmatprep.mubr.bf16.mxu0 %v613_v5  ;;  %580 = vmatprep.mubr.bf16.mxu1 %v614_v6  ;;  %v611_v9 = vld [vmem:[%s834_s0 + $0x8] sm:$0xff]   ;;  %v612_v10 = vld [vmem:[%s834_s0] sm:$0xff]  }
   0x6   :  { %34 = vst.msk [vmem:[#allocation2 + $0x50] sm:$0xff] %vm23_vm0, %v621_v1  ;;  %35 = vst.msk [vmem:[#allocation2 + $0x58] sm:$0xff] %vm23_vm0, %v621_v1  ;;  %v615_v11 = vld [vmem:[%s835_s1 + $0x8] sm:$0xff]   ;;  %v617_v13 = vld [vmem:[%s835_s1 + $0x10] sm:$0xff]  }
   0x7   :  { %36 = vst.msk [vmem:[#allocation2 + $0x60] sm:$0xff] %vm23_vm0, %v621_v1  ;;  %37 = vst.msk [vmem:[#allocation2 + $0x68] sm:$0xff] %vm23_vm0, %v621_v1  ;;  %559 = vmatpush3.bf16.msra.mxu0 %v606_v2  ;;  %597 = vmatpush3.bf16.msra.mxu1 %v606_v2  ;;  %v616_v12 = vld [vmem:[%s835_s1 + $0x28] sm:$0xff]   ;;  %v618_v14 = vld [vmem:[%s835_s1 + $0x30] sm:$0xff]  }
   0x8   :  { %38 = vst.msk [vmem:[#allocation2 + $0x70] sm:$0xff] %vm23_vm0, %v621_v1  ;;  %39 = vst.msk [vmem:[#allocation2 + $0x78] sm:$0xff] %vm23_vm0, %v621_v1  ;;  %560 = vmatprep.subr.bf16.mxu0 %v607_v3  ;;  %590 = vmatprep.subr.bf16.mxu1 %v607_v3  ;;  %v619_v15 = vld [vmem:[%s835_s1 + $0x18] sm:$0xff]   ;;  %v42_v17 = vld [vmem:[#allocation2 + $0x10] sm:$0xff] }
   0x9   :  { %v620_v16 = vld [vmem:[%s835_s1 + $0x38] sm:$0xff]   ;;  %v40_v21 = vld [vmem:[#allocation2] sm:$0xff]  ;;  %v41_v33 = vld [vmem:[#allocation2 + $0x8] sm:$0xff] }
   0xa   :  { %v43_v27 = vld [vmem:[#allocation2 + $0x18] sm:$0xff]  ;;  %v720_v43 = vld [vmem:[%s836_s2] ss:$0 sm:$0xff] }
   0xb   :  { %561 = vmatpush3.bf16.msra.mxu0 %v607_v3  ;;  %598 = vmatpush3.bf16.msra.mxu1 %v607_v3  ;;  %v46_v39 = vld [vmem:[#allocation2 + $0x30] sm:$0xff]  ;;  %v44_v46 = vld [vmem:[#allocation2 + $0x20] sm:$0xff]  ;;  %v47_v59 = vld [vmem:[#allocation2 + $0x38] sm:$0xff] }
   0xc   :  { %562 = vmatprep.subr.bf16.mxu0 %v608_v4  ;;  %591 = vmatprep.subr.bf16.mxu1 %v608_v4  ;;  %v48_v22 = vld [vmem:[#allocation2 + $0x40] sm:$0xff]  ;;  %v49_v34 = vld [vmem:[#allocation2 + $0x48] sm:$0xff] }
   0xd   :  { %v50_v18 = vld [vmem:[#allocation2 + $0x50] sm:$0xff]  ;;  %v51_v28 = vld [vmem:[#allocation2 + $0x58] sm:$0xff] }
   0xe   :  { %v52_v47 = vld [vmem:[#allocation2 + $0x60] sm:$0xff] }
   0xf   :  { %563 = vmatpush3.bf16.msra.mxu0 %v608_v4  ;;  %599 = vmatpush3.bf16.msra.mxu1 %v608_v4  ;;  %v54_v40 = vld [vmem:[#allocation2 + $0x70] sm:$0xff]  ;;  %v55_v60 = vld [vmem:[#allocation2 + $0x78] sm:$0xff] }
  0x10   :  { %564 = vmatprep.subr.bf16.mxu0 %v609_v7  ;;  %592 = vmatprep.subr.bf16.mxu1 %v609_v7 }
  0x13   :  { %565 = vmatpush3.bf16.msra.mxu0 %v609_v7  ;;  %600 = vmatpush3.bf16.msra.mxu1 %v609_v7 }
  0x14   :  { %566 = vmatprep.subr.bf16.mxu0 %v610_v8  ;;  %593 = vmatprep.subr.bf16.mxu1 %v610_v8 }
  0x17   :  { %567 = vmatpush3.bf16.msra.mxu0 %v610_v8  ;;  %601 = vmatpush3.bf16.msra.mxu1 %v610_v8 }
  0x18   :  { %568 = vmatprep.subr.bf16.mxu0 %v611_v9  ;;  %594 = vmatprep.subr.bf16.mxu1 %v611_v9 }
  0x1b   :  { %569 = vmatpush3.bf16.msra.mxu0 %v611_v9  ;;  %602 = vmatpush3.bf16.msra.mxu1 %v611_v9 }
  0x1c   :  { %570 = vmatprep.subr.bf16.mxu0 %v612_v10  ;;  %595 = vmatprep.subr.bf16.mxu1 %v612_v10 }
  0x1f   :  { %571 = vmatpush3.bf16.msra.mxu0 %v612_v10  ;;  %603 = vmatpush3.bf16.msra.mxu1 %v612_v10 }
  0x22   :  { %573 = vmatmul.mubr.bf16.vlgmr.msra.gmra.mxu0 %v615_v11  ;;  %581 = vmatmul.mubr.bf16.vlgmr.msra.gmra.mxu1 %v616_v12 }
  0x23   :  { %576 = vmatprep.mubr.bf16.mxu0 %v617_v13  ;;  %584 = vmatprep.mubr.bf16.mxu1 %v618_v14 }
  0x2a   :  { %577 = vmatmul.mubr.bf16.gmra.mxu0 %v619_v15  ;;  %585 = vmatmul.mubr.bf16.gmra.mxu1 %v620_v16 }
  0xe2   :  { %v574_v19 = vpop.f32.mrf.mxu0  ;;  %v582_v20 = vpop.f32.mrf.mxu1 }
  0xe3   :  { %v283_v23 = vadd.f32 %v574_v19, %v42_v17  ;;  %v291_v24 = vadd.f32 %v582_v20, %v50_v18 }
  0xe4   :  { %v218_v25 = vpop.f32.mrf.mxu0  ;;  %v250_v26 = vpop.f32.mrf.mxu1 }
  0xe5   :  { %300 = vst.msk [vmem:[#allocation2 + $0x10] sm:$0xff] %vm23_vm0, %v283_v23  ;;  %308 = vst.msk [vmem:[#allocation2 + $0x50] sm:$0xff] %vm23_vm0, %v291_v24  ;;  %v281_v29 = vadd.f32 %v218_v25, %v40_v21  ;;  %v289_v30 = vadd.f32 %v250_v26, %v48_v22 }
  0xe6   :  { %v575_v31 = vpop.f32.mrf.mxu0  ;;  %v583_v32 = vpop.f32.mrf.mxu1 }
  0xe7   :  { %298 = vst.msk [vmem:[#allocation2] sm:$0xff] %vm23_vm0, %v281_v29  ;;  %306 = vst.msk [vmem:[#allocation2 + $0x40] sm:$0xff] %vm23_vm0, %v289_v30  ;;  %v284_v35 = vadd.f32 %v575_v31, %v43_v27  ;;  %v292_v36 = vadd.f32 %v583_v32, %v51_v28  ;;  %v45_v29 = vld [vmem:[#allocation2 + $0x28] sm:$0xff] }
  0xe8   :  { %v221_v37 = vpop.f32.mrf.mxu0  ;;  %v253_v38 = vpop.f32.mrf.mxu1 }
  0xe9   :  { %301 = vst.msk [vmem:[#allocation2 + $0x18] sm:$0xff] %vm23_vm0, %v284_v35  ;;  %309 = vst.msk [vmem:[#allocation2 + $0x58] sm:$0xff] %vm23_vm0, %v292_v36  ;;  %v282_v41 = vadd.f32 %v221_v37, %v41_v33  ;;  %v290_v42 = vadd.f32 %v253_v38, %v49_v34  ;;  %v53_v36 = vld [vmem:[#allocation2 + $0x68] sm:$0xff] }
  0xea   :  { %v578_v44 = vpop.f32.mrf.mxu0  ;;  %v586_v45 = vpop.f32.mrf.mxu1 }
  0xeb   :  { %299 = vst.msk [vmem:[#allocation2 + $0x8] sm:$0xff] %vm23_vm0, %v282_v41  ;;  %307 = vst.msk [vmem:[#allocation2 + $0x48] sm:$0xff] %vm23_vm0, %v290_v42  ;;  %v287_v48 = vadd.f32 %v578_v44, %v46_v39  ;;  %v295_v49 = vadd.f32 %v586_v45, %v54_v40 }
  0xec   :  { %v319_v50 = vld [vmem:[#allocation2 + $0x10] sm:$0xff]  ;;  %v234_v53 = vpop.f32.mrf.mxu0  ;;  %v266_v54 = vpop.f32.mrf.mxu1 }
  0xed   :  { %v327_v52 = vld [vmem:[#allocation2 + $0x50] sm:$0xff]  ;;  %v342_v55 = vadd.f32 %v720_v43, %v319_v50  ;;  %304 = vst.msk [vmem:[#allocation2 + $0x30] sm:$0xff] %vm23_vm0, %v287_v48  ;;  %312 = vst.msk [vmem:[#allocation2 + $0x70] sm:$0xff] %vm23_vm0, %v295_v49  ;;  %v285_v57 = vadd.f32 %v234_v53, %v44_v46  ;;  %v293_v58 = vadd.f32 %v266_v54, %v52_v47 }
  0xee   :  { %v350_v56 = vadd.f32 %v720_v43, %v327_v52  ;;  %v317_v61 = vld [vmem:[#allocation2] sm:$0xff]  ;;  %v579_v63 = vpop.f32.mrf.mxu0  ;;  %v587_v0 = vpop.f32.mrf.mxu1 }
  0xef   :  { %v325_v62 = vld [vmem:[#allocation2 + $0x40] sm:$0xff]  ;;  %vm359_vm2 = vcmp.ge.f32.partialorder %v342_v55, 0.0  ;;  %v376_v1 = vmul.f32 %v727_v51, %v342_v55  ;;  %302 = vst.msk [vmem:[#allocation2 + $0x20] sm:$0xff] %vm23_vm0, %v285_v57  ;;  %310 = vst.msk [vmem:[#allocation2 + $0x60] sm:$0xff] %vm23_vm0, %v293_v58  ;;  %v340_v3 = vadd.f32 %v720_v43, %v317_v61  ;;  %v288_v7 = vadd.f32 %v579_v63, %v47_v59 }
  0xf0   :  { %vm367_vm3 = vcmp.ge.f32.partialorder %v350_v56, 0.0  ;;  %v384_v2 = vmul.f32 %v727_v51, %v350_v56  ;;  %v348_v4 = vadd.f32 %v720_v43, %v325_v62  ;;  %v320_v5 = vld [vmem:[#allocation2 + $0x18] sm:$0xff]  ;;  %v296_v8 = vadd.f32 %v587_v0, %v55_v60  ;;  %v237_v35 = vpop.f32.mrf.mxu0  ;;  %v269_v37 = vpop.f32.mrf.mxu1 }
  0xf1   :  { %v328_v6 = vld [vmem:[#allocation2 + $0x58] sm:$0xff]  ;;  %v392_v9 = vsel %vm359_vm2, %v342_v55, %v376_v1  ;;  %v343_v11 = vadd.f32 %v720_v43, %v320_v5  ;;  %vm357_vm4 = vcmp.ge.f32.partialorder %v340_v3, 0.0  ;;  %v374_v15 = vmul.f32 %v727_v51, %v340_v3  ;;  %305 = vst.msk [vmem:[#allocation2 + $0x38] sm:$0xff] %vm23_vm0, %v288_v7 }
  0xf2   :  { %v400_v10 = vsel %vm367_vm3, %v350_v56, %v384_v2  ;;  %v351_v12 = vadd.f32 %v720_v43, %v328_v6  ;;  %v526_v13 = vpack.c.bf16 %v392_v9, %v392_v9  ;;  %v318_v16 = vld [vmem:[#allocation2 + $0x8] sm:$0xff]  ;;  %313 = vst.msk [vmem:[#allocation2 + $0x78] sm:$0xff] %vm23_vm0, %v296_v8  ;;  %vm365_vm5 = vcmp.ge.f32.partialorder %v348_v4, 0.0 }
  0xf3   :  { %v534_v14 = vpack.c.bf16 %v400_v10, %v400_v10  ;;  %v326_v17 = vld [vmem:[#allocation2 + $0x48] sm:$0xff]  ;;  %v382_v18 = vmul.f32 %v727_v51, %v348_v4  ;;  %vm360_vm6 = vcmp.ge.f32.partialorder %v343_v11, 0.0  ;;  %v377_v19 = vmul.f32 %v727_v51, %v343_v11 }
  0xf4   :  { %473 = vst.msk [vmem:[%s838_s4 + $0x8] sm:$0xf] %vm470_vm1, %v526_v13  ;;  %v390_v20 = vsel %vm357_vm4, %v340_v3, %v374_v15  ;;  %vm368_vm7 = vcmp.ge.f32.partialorder %v351_v12, 0.0  ;;  %v385_v21 = vmul.f32 %v727_v51, %v351_v12  ;;  %v341_v22 = vadd.f32 %v720_v43, %v318_v16  ;;  %v323_v27 = vld [vmem:[#allocation2 + $0x30] sm:$0xff] }
  0xf5   :  { %481 = vst.msk [vmem:[%s838_s4 + $0x28] sm:$0xf] %vm470_vm1, %v534_v14  ;;  %v524_v23 = vpack.c.bf16 %v390_v20, %v390_v20  ;;  %v398_v24 = vsel %vm365_vm5, %v348_v4, %v382_v18  ;;  %v393_v25 = vsel %vm360_vm6, %v343_v11, %v377_v19  ;;  %v349_v26 = vadd.f32 %v720_v43, %v326_v17  ;;  %v331_v28 = vld [vmem:[#allocation2 + $0x70] sm:$0xff] }
  0xf6   :  { %v532_v30 = vpack.c.bf16 %v398_v24, %v398_v24  ;;  %v527_v31 = vpack.c.bf16 %v393_v25, %v393_v25  ;;  %v401_v32 = vsel %vm368_vm7, %v351_v12, %v385_v21  ;;  %vm358_vm8 = vcmp.ge.f32.partialorder %v341_v22, 0.0  ;;  %v321_v33 = vld [vmem:[#allocation2 + $0x20] sm:$0xff] }
  0xf7   :  { %v329_v34 = vld [vmem:[#allocation2 + $0x60] sm:$0xff]  ;;  %471 = vst.msk [vmem:[%s838_s4] sm:$0xf] %vm470_vm1, %v524_v23  ;;  %v535_v38 = vpack.c.bf16 %v401_v32, %v401_v32  ;;  %v375_v39 = vmul.f32 %v727_v51, %v341_v22  ;;  %vm366_vm9 = vcmp.ge.f32.partialorder %v349_v26, 0.0  ;;  %v383_v40 = vmul.f32 %v727_v51, %v349_v26 }
  0xf8   :  { %479 = vst.msk [vmem:[%s838_s4 + $0x20] sm:$0xf] %vm470_vm1, %v532_v30  ;;  %474 = vst.msk [vmem:[%s838_s4 + $0xc] sm:$0xf] %vm470_vm1, %v527_v31  ;;  %v346_v41 = vadd.f32 %v720_v43, %v323_v27  ;;  %v354_v42 = vadd.f32 %v720_v43, %v331_v28  ;;  %v344_v44 = vadd.f32 %v720_v43, %v321_v33  ;;  %v324_v48 = vld [vmem:[#allocation2 + $0x38] sm:$0xff] }
  0xf9   :  { %v352_v45 = vadd.f32 %v720_v43, %v329_v34  ;;  %482 = vst.msk [vmem:[%s838_s4 + $0x2c] sm:$0xf] %vm470_vm1, %v535_v38  ;;  %v391_v46 = vsel %vm358_vm8, %v341_v22, %v375_v39  ;;  %v399_v47 = vsel %vm366_vm9, %v349_v26, %v383_v40  ;;  %v286_v49 = vadd.f32 %v237_v35, %v45_v29  ;;  %v332_v55 = vld [vmem:[#allocation2 + $0x78] sm:$0xff] }
  0xfa   :  { %v294_v50 = vadd.f32 %v269_v37, %v53_v36  ;;  %v525_v52 = vpack.c.bf16 %v391_v46, %v391_v46  ;;  %v533_v53 = vpack.c.bf16 %v399_v47, %v399_v47  ;;  %vm363_vm10 = vcmp.ge.f32.partialorder %v346_v41, 0.0 }
  0xfb   :  { %v380_v54 = vmul.f32 %v727_v51, %v346_v41  ;;  %vm371_vm11 = vcmp.ge.f32.partialorder %v354_v42, 0.0  ;;  %v388_v56 = vmul.f32 %v727_v51, %v354_v42  ;;  %vm361_vm12 = vcmp.ge.f32.partialorder %v344_v44, 0.0  ;;  %303 = vst.msk [vmem:[#allocation2 + $0x28] sm:$0xff] %vm23_vm0, %v286_v49 }
  0xfc   :  { %v378_v57 = vmul.f32 %v727_v51, %v344_v44  ;;  %311 = vst.msk [vmem:[#allocation2 + $0x68] sm:$0xff] %vm23_vm0, %v294_v50  ;;  %vm369_vm13 = vcmp.ge.f32.partialorder %v352_v45, 0.0  ;;  %v386_v59 = vmul.f32 %v727_v51, %v352_v45  ;;  %v347_v60 = vadd.f32 %v720_v43, %v324_v48 }
  0xfd   :  { %472 = vst.msk [vmem:[%s838_s4 + $0x4] sm:$0xf] %vm470_vm1, %v525_v52  ;;  %480 = vst.msk [vmem:[%s838_s4 + $0x24] sm:$0xf] %vm470_vm1, %v533_v53  ;;  %v396_v58 = vsel %vm363_vm10, %v346_v41, %v380_v54  ;;  %v404_v62 = vsel %vm371_vm11, %v354_v42, %v388_v56  ;;  %v355_v0 = vadd.f32 %v720_v43, %v332_v55 }
  0xfe   :  { %v530_v61 = vpack.c.bf16 %v396_v58, %v396_v58  ;;  %v394_v63 = vsel %vm361_vm12, %v344_v44, %v378_v57  ;;  %v538_v1 = vpack.c.bf16 %v404_v62, %v404_v62  ;;  %v402_v3 = vsel %vm369_vm13, %v352_v45, %v386_v59 }
  0xff   :  { %v528_v2 = vpack.c.bf16 %v394_v63, %v394_v63  ;;  %vm364_vm14 = vcmp.ge.f32.partialorder %v347_v60, 0.0  ;;  %v536_v4 = vpack.c.bf16 %v402_v3, %v402_v3  ;;  %v381_v5 = vmul.f32 %v727_v51, %v347_v60 }
 0x100   :  { %477 = vst.msk [vmem:[%s838_s4 + $0x18] sm:$0xf] %vm470_vm1, %v530_v61  ;;  %vm372_vm15 = vcmp.ge.f32.partialorder %v355_v0, 0.0  ;;  %v389_v6 = vmul.f32 %v727_v51, %v355_v0  ;;  %485 = vst.msk [vmem:[%s838_s4 + $0x38] sm:$0xf] %vm470_vm1, %v538_v1 }
 0x101   :  { %475 = vst.msk [vmem:[%s838_s4 + $0x10] sm:$0xf] %vm470_vm1, %v528_v2  ;;  %483 = vst.msk [vmem:[%s838_s4 + $0x30] sm:$0xf] %vm470_vm1, %v536_v4  ;;  %v397_v7 = vsel %vm364_vm14, %v347_v60, %v381_v5 }
 0x102   :  { %v405_v8 = vsel %vm372_vm15, %v355_v0, %v389_v6  ;;  %v531_v9 = vpack.c.bf16 %v397_v7, %v397_v7  ;;  %v322_v11 = vld [vmem:[#allocation2 + $0x28] sm:$0xff] }
 0x103   :  { %v539_v10 = vpack.c.bf16 %v405_v8, %v405_v8  ;;  %v330_v12 = vld [vmem:[#allocation2 + $0x68] sm:$0xff]  ;;  %v345_v13 = vadd.f32 %v720_v43, %v322_v11 }
 0x104   :  { %v353_v14 = vadd.f32 %v720_v43, %v330_v12  ;;  %478 = vst.msk [vmem:[%s838_s4 + $0x1c] sm:$0xf] %vm470_vm1, %v531_v9 }
 0x105   :  { %486 = vst.msk [vmem:[%s838_s4 + $0x3c] sm:$0xf] %vm470_vm1, %v539_v10  ;;  %vm362_vm0 = vcmp.ge.f32.partialorder %v345_v13, 0.0  ;;  %v379_v15 = vmul.f32 %v727_v51, %v345_v13 }
 0x106   :  { %vm370_vm2 = vcmp.ge.f32.partialorder %v353_v14, 0.0  ;;  %v387_v16 = vmul.f32 %v727_v51, %v353_v14 }
 0x107   :  { %v395_v17 = vsel %vm362_vm0, %v345_v13, %v379_v15 }
 0x108   :  { %v403_v18 = vsel %vm370_vm2, %v353_v14, %v387_v16  ;;  %v529_v19 = vpack.c.bf16 %v395_v17, %v395_v17 }
 0x109   :  { %v537_v43 = vpack.c.bf16 %v403_v18, %v403_v18 }
 0x10a   :  { %476 = vst.msk [vmem:[%s838_s4 + $0x14] sm:$0xf] %vm470_vm1, %v529_v19 }
 0x10b   :  { %484 = vst.msk [vmem:[%s838_s4 + $0x34] sm:$0xf] %vm470_vm1, %v537_v43 }

// kernel: ocdib_forward.4
= control target key start
LH: loop header
LB: loop body
LE: loop exit
PB: predicated region body
PF: predicated region fallthrough
CT: control target
= control target key end

     0   :  { %vm23_vm0 = vcmask 261120   ;;  %v524_v1 = vmov 0.0   ;;  %s736_s0 = inlined_call_operand.vmem [shape: bf16[128,32], index: 0, kind: input, shape index: {}]   ;;  %s737_s1 = inlined_call_operand.vmem [shape: bf16[128,128], index: 1, kind: input, shape index: {}]   ;;  %s738_s2 = inlined_call_operand.vmem [shape: f32[1,32], index: 2, kind: input, shape index: {}]   ;;  %s739_s3 = inlined_call_operand.<no memory space> [shape: f32[1], index: 3, kind: input, shape index: {}]   ;;  %s740_s4 = inlined_call_operand.vmem [shape: f32[128,32], index: 4, kind: output, shape index: {}]  }
   0x1   :  { %v508_v0 = vld [vmem:[%s736_s0 + $0x38] sm:$0xff]   ;;  %26 = vst.msk [vmem:[#allocation2 + $0x10] sm:$0xff] %vm23_vm0, %v524_v1  ;;  %24 = vst.msk [vmem:[#allocation2] sm:$0xff] %vm23_vm0, %v524_v1  ;;  %v509_v2 = vld [vmem:[%s736_s0 + $0x30] sm:$0xff]   ;;  %v630_v51 = vstv %s739_s3 }
   0x2   :  { %25 = vst.msk [vmem:[#allocation2 + $0x8] sm:$0xff] %vm23_vm0, %v524_v1  ;;  %27 = vst.msk [vmem:[#allocation2 + $0x18] sm:$0xff] %vm23_vm0, %v524_v1  ;;  %459 = vmatprep.subr.bf16.mxu0 %v508_v0  ;;  %491 = vmatprep.subr.bf16.mxu1 %v508_v0  ;;  %v510_v3 = vld [vmem:[%s736_s0 + $0x28] sm:$0xff]   ;;  %v511_v4 = vld [vmem:[%s736_s0 + $0x20] sm:$0xff]  }
   0x3   :  { %28 = vst.msk [vmem:[#allocation2 + $0x20] sm:$0xff] %vm23_vm0, %v524_v1  ;;  %29 = vst.msk [vmem:[#allocation2 + $0x28] sm:$0xff] %vm23_vm0, %v524_v1  ;;  %460 = vmatpush3.bf16.msra.mxu0 %v508_v0  ;;  %499 = vmatpush3.bf16.msra.mxu1 %v508_v0  ;;  %v516_v5 = vld [vmem:[%s737_s1] sm:$0xff]   ;;  %v512_v7 = vld [vmem:[%s736_s0 + $0x18] sm:$0xff]  }
   0x4   :  { %30 = vst.msk [vmem:[#allocation2 + $0x30] sm:$0xff] %vm23_vm0, %v524_v1  ;;  %31 = vst.msk [vmem:[#allocation2 + $0x38] sm:$0xff] %vm23_vm0, %v524_v1  ;;  %461 = vmatprep.subr.bf16.mxu0 %v509_v2  ;;  %492 = vmatprep.subr.bf16.mxu1 %v509_v2  ;;  %v517_v6 = vld [vmem:[%s737_s1 + $0x20] sm:$0xff]   ;;  %v513_v8 = vld [vmem:[%s736_s0 + $0x10] sm:$0xff]  }
   0x5   :  { %32 = vst.msk [vmem:[#allocation2 + $0x40] sm:$0xff] %vm23_vm0, %v524_v1  ;;  %33 = vst.msk [vmem:[#allocation2 + $0x48] sm:$0xff] %vm23_vm0, %v524_v1  ;;  %475 = vmatprep.mubr.bf16.mxu0 %v516_v5  ;;  %483 = vmatprep.mubr.bf16.mxu1 %v517_v6  ;;  %v514_v9 = vld [vmem:[%s736_s0 + $0x8] sm:$0xff]   ;;  %v515_v10 = vld [vmem:[%s736_s0] sm:$0xff]  }
   0x6   :  { %34 = vst.msk [vmem:[#allocation2 + $0x50] sm:$0xff] %vm23_vm0, %v524_v1  ;;  %35 = vst.msk [vmem:[#allocation2 + $0x58] sm:$0xff] %vm23_vm0, %v524_v1  ;;  %v518_v11 = vld [vmem:[%s737_s1 + $0x8] sm:$0xff]   ;;  %v520_v13 = vld [vmem:[%s737_s1 + $0x10] sm:$0xff]  }
   0x7   :  { %36 = vst.msk [vmem:[#allocation2 + $0x60] sm:$0xff] %vm23_vm0, %v524_v1  ;;  %37 = vst.msk [vmem:[#allocation2 + $0x68] sm:$0xff] %vm23_vm0, %v524_v1  ;;  %462 = vmatpush3.bf16.msra.mxu0 %v509_v2  ;;  %500 = vmatpush3.bf16.msra.mxu1 %v509_v2  ;;  %v519_v12 = vld [vmem:[%s737_s1 + $0x28] sm:$0xff]   ;;  %v521_v14 = vld [vmem:[%s737_s1 + $0x30] sm:$0xff]  }
   0x8   :  { %38 = vst.msk [vmem:[#allocation2 + $0x70] sm:$0xff] %vm23_vm0, %v524_v1  ;;  %39 = vst.msk [vmem:[#allocation2 + $0x78] sm:$0xff] %vm23_vm0, %v524_v1  ;;  %463 = vmatprep.subr.bf16.mxu0 %v510_v3  ;;  %493 = vmatprep.subr.bf16.mxu1 %v510_v3  ;;  %v522_v15 = vld [vmem:[%s737_s1 + $0x18] sm:$0xff]   ;;  %v42_v17 = vld [vmem:[#allocation2 + $0x10] sm:$0xff] }
   0x9   :  { %v523_v16 = vld [vmem:[%s737_s1 + $0x38] sm:$0xff]   ;;  %v40_v21 = vld [vmem:[#allocation2] sm:$0xff]  ;;  %v41_v33 = vld [vmem:[#allocation2 + $0x8] sm:$0xff] }
   0xa   :  { %v43_v27 = vld [vmem:[#allocation2 + $0x18] sm:$0xff]  ;;  %v623_v43 = vld [vmem:[%s738_s2] ss:$0 sm:$0xff] }
   0xb   :  { %464 = vmatpush3.bf16.msra.mxu0 %v510_v3  ;;  %501 = vmatpush3.bf16.msra.mxu1 %v510_v3  ;;  %v46_v39 = vld [vmem:[#allocation2 + $0x30] sm:$0xff]  ;;  %v44_v46 = vld [vmem:[#allocation2 + $0x20] sm:$0xff]  ;;  %v47_v59 = vld [vmem:[#allocation2 + $0x38] sm:$0xff] }
   0xc   :  { %465 = vmatprep.subr.bf16.mxu0 %v511_v4  ;;  %494 = vmatprep.subr.bf16.mxu1 %v511_v4  ;;  %v48_v22 = vld [vmem:[#allocation2 + $0x40] sm:$0xff]  ;;  %v49_v34 = vld [vmem:[#allocation2 + $0x48] sm:$0xff] }
   0xd   :  { %v50_v18 = vld [vmem:[#allocation2 + $0x50] sm:$0xff]  ;;  %v51_v28 = vld [vmem:[#allocation2 + $0x58] sm:$0xff] }
   0xe   :  { %v52_v47 = vld [vmem:[#allocation2 + $0x60] sm:$0xff] }
   0xf   :  { %466 = vmatpush3.bf16.msra.mxu0 %v511_v4  ;;  %502 = vmatpush3.bf16.msra.mxu1 %v511_v4  ;;  %v54_v40 = vld [vmem:[#allocation2 + $0x70] sm:$0xff]  ;;  %v55_v60 = vld [vmem:[#allocation2 + $0x78] sm:$0xff] }
  0x10   :  { %467 = vmatprep.subr.bf16.mxu0 %v512_v7  ;;  %495 = vmatprep.subr.bf16.mxu1 %v512_v7 }
  0x13   :  { %468 = vmatpush3.bf16.msra.mxu0 %v512_v7  ;;  %503 = vmatpush3.bf16.msra.mxu1 %v512_v7 }
  0x14   :  { %469 = vmatprep.subr.bf16.mxu0 %v513_v8  ;;  %496 = vmatprep.subr.bf16.mxu1 %v513_v8 }
  0x17   :  { %470 = vmatpush3.bf16.msra.mxu0 %v513_v8  ;;  %504 = vmatpush3.bf16.msra.mxu1 %v513_v8 }
  0x18   :  { %471 = vmatprep.subr.bf16.mxu0 %v514_v9  ;;  %497 = vmatprep.subr.bf16.mxu1 %v514_v9 }
  0x1b   :  { %472 = vmatpush3.bf16.msra.mxu0 %v514_v9  ;;  %505 = vmatpush3.bf16.msra.mxu1 %v514_v9 }
  0x1c   :  { %473 = vmatprep.subr.bf16.mxu0 %v515_v10  ;;  %498 = vmatprep.subr.bf16.mxu1 %v515_v10 }
  0x1f   :  { %474 = vmatpush3.bf16.msra.mxu0 %v515_v10  ;;  %506 = vmatpush3.bf16.msra.mxu1 %v515_v10 }
  0x22   :  { %476 = vmatmul.mubr.bf16.vlgmr.msra.gmra.mxu0 %v518_v11  ;;  %484 = vmatmul.mubr.bf16.vlgmr.msra.gmra.mxu1 %v519_v12 }
  0x23   :  { %479 = vmatprep.mubr.bf16.mxu0 %v520_v13  ;;  %487 = vmatprep.mubr.bf16.mxu1 %v521_v14 }
  0x2a   :  { %480 = vmatmul.mubr.bf16.gmra.mxu0 %v522_v15  ;;  %488 = vmatmul.mubr.bf16.gmra.mxu1 %v523_v16 }
  0xe2   :  { %v477_v19 = vpop.f32.mrf.mxu0  ;;  %v485_v20 = vpop.f32.mrf.mxu1 }
  0xe3   :  { %v283_v23 = vadd.f32 %v477_v19, %v42_v17  ;;  %v291_v24 = vadd.f32 %v485_v20, %v50_v18 }
  0xe4   :  { %v218_v25 = vpop.f32.mrf.mxu0  ;;  %v250_v26 = vpop.f32.mrf.mxu1 }
  0xe5   :  { %300 = vst.msk [vmem:[#allocation2 + $0x10] sm:$0xff] %vm23_vm0, %v283_v23  ;;  %308 = vst.msk [vmem:[#allocation2 + $0x50] sm:$0xff] %vm23_vm0, %v291_v24  ;;  %v281_v29 = vadd.f32 %v218_v25, %v40_v21  ;;  %v289_v30 = vadd.f32 %v250_v26, %v48_v22 }
  0xe6   :  { %v478_v31 = vpop.f32.mrf.mxu0  ;;  %v486_v32 = vpop.f32.mrf.mxu1 }
  0xe7   :  { %298 = vst.msk [vmem:[#allocation2] sm:$0xff] %vm23_vm0, %v281_v29  ;;  %306 = vst.msk [vmem:[#allocation2 + $0x40] sm:$0xff] %vm23_vm0, %v289_v30  ;;  %v284_v35 = vadd.f32 %v478_v31, %v43_v27  ;;  %v292_v36 = vadd.f32 %v486_v32, %v51_v28  ;;  %v45_v29 = vld [vmem:[#allocation2 + $0x28] sm:$0xff] }
  0xe8   :  { %v221_v37 = vpop.f32.mrf.mxu0  ;;  %v253_v38 = vpop.f32.mrf.mxu1 }
  0xe9   :  { %301 = vst.msk [vmem:[#allocation2 + $0x18] sm:$0xff] %vm23_vm0, %v284_v35  ;;  %309 = vst.msk [vmem:[#allocation2 + $0x58] sm:$0xff] %vm23_vm0, %v292_v36  ;;  %v282_v41 = vadd.f32 %v221_v37, %v41_v33  ;;  %v290_v42 = vadd.f32 %v253_v38, %v49_v34  ;;  %v53_v35 = vld [vmem:[#allocation2 + $0x68] sm:$0xff] }
  0xea   :  { %v481_v44 = vpop.f32.mrf.mxu0  ;;  %v489_v45 = vpop.f32.mrf.mxu1 }
  0xeb   :  { %299 = vst.msk [vmem:[#allocation2 + $0x8] sm:$0xff] %vm23_vm0, %v282_v41  ;;  %307 = vst.msk [vmem:[#allocation2 + $0x48] sm:$0xff] %vm23_vm0, %v290_v42  ;;  %v287_v48 = vadd.f32 %v481_v44, %v46_v39  ;;  %v295_v49 = vadd.f32 %v489_v45, %v54_v40 }
  0xec   :  { %v319_v50 = vld [vmem:[#allocation2 + $0x10] sm:$0xff]  ;;  %v234_v53 = vpop.f32.mrf.mxu0  ;;  %v266_v54 = vpop.f32.mrf.mxu1 }
  0xed   :  { %v327_v52 = vld [vmem:[#allocation2 + $0x50] sm:$0xff]  ;;  %v342_v55 = vadd.f32 %v623_v43, %v319_v50  ;;  %304 = vst.msk [vmem:[#allocation2 + $0x30] sm:$0xff] %vm23_vm0, %v287_v48  ;;  %312 = vst.msk [vmem:[#allocation2 + $0x70] sm:$0xff] %vm23_vm0, %v295_v49  ;;  %v285_v57 = vadd.f32 %v234_v53, %v44_v46  ;;  %v293_v58 = vadd.f32 %v266_v54, %v52_v47 }
  0xee   :  { %v350_v56 = vadd.f32 %v623_v43, %v327_v52  ;;  %v317_v61 = vld [vmem:[#allocation2] sm:$0xff]  ;;  %v482_v63 = vpop.f32.mrf.mxu0  ;;  %v490_v0 = vpop.f32.mrf.mxu1 }
  0xef   :  { %v325_v62 = vld [vmem:[#allocation2 + $0x40] sm:$0xff]  ;;  %vm359_vm1 = vcmp.ge.f32.partialorder %v342_v55, 0.0  ;;  %v376_v1 = vmul.f32 %v630_v51, %v342_v55  ;;  %302 = vst.msk [vmem:[#allocation2 + $0x20] sm:$0xff] %vm23_vm0, %v285_v57  ;;  %310 = vst.msk [vmem:[#allocation2 + $0x60] sm:$0xff] %vm23_vm0, %v293_v58  ;;  %v340_v3 = vadd.f32 %v623_v43, %v317_v61  ;;  %v288_v7 = vadd.f32 %v482_v63, %v47_v59 }
  0xf0   :  { %vm367_vm2 = vcmp.ge.f32.partialorder %v350_v56, 0.0  ;;  %v384_v2 = vmul.f32 %v630_v51, %v350_v56  ;;  %v348_v4 = vadd.f32 %v623_v43, %v325_v62  ;;  %v320_v5 = vld [vmem:[#allocation2 + $0x18] sm:$0xff]  ;;  %v296_v8 = vadd.f32 %v490_v0, %v55_v60  ;;  %v237_v34 = vpop.f32.mrf.mxu0  ;;  %v269_v36 = vpop.f32.mrf.mxu1 }
  0xf1   :  { %v328_v6 = vld [vmem:[#allocation2 + $0x58] sm:$0xff]  ;;  %v392_v9 = vsel %vm359_vm1, %v342_v55, %v376_v1  ;;  %v343_v11 = vadd.f32 %v623_v43, %v320_v5  ;;  %vm357_vm3 = vcmp.ge.f32.partialorder %v340_v3, 0.0  ;;  %v374_v13 = vmul.f32 %v630_v51, %v340_v3  ;;  %305 = vst.msk [vmem:[#allocation2 + $0x38] sm:$0xff] %vm23_vm0, %v288_v7 }
  0xf2   :  { %v400_v10 = vsel %vm367_vm2, %v350_v56, %v384_v2  ;;  %v351_v12 = vadd.f32 %v623_v43, %v328_v6  ;;  %408 = vst.msk [vmem:[%s740_s4 + $0x10] sm:$0xff] %vm23_vm0, %v392_v9  ;;  %vm365_vm4 = vcmp.ge.f32.partialorder %v348_v4, 0.0  ;;  %v382_v14 = vmul.f32 %v630_v51, %v348_v4  ;;  %v318_v15 = vld [vmem:[#allocation2 + $0x8] sm:$0xff]  ;;  %313 = vst.msk [vmem:[#allocation2 + $0x78] sm:$0xff] %vm23_vm0, %v296_v8 }
  0xf3   :  { %416 = vst.msk [vmem:[%s740_s4 + $0x50] sm:$0xff] %vm23_vm0, %v400_v10  ;;  %v326_v16 = vld [vmem:[#allocation2 + $0x48] sm:$0xff]  ;;  %vm360_vm5 = vcmp.ge.f32.partialorder %v343_v11, 0.0  ;;  %v377_v17 = vmul.f32 %v630_v51, %v343_v11  ;;  %v390_v19 = vsel %vm357_vm3, %v340_v3, %v374_v13  ;;  %v341_v21 = vadd.f32 %v623_v43, %v318_v15 }
  0xf4   :  { %vm368_vm6 = vcmp.ge.f32.partialorder %v351_v12, 0.0  ;;  %v385_v18 = vmul.f32 %v630_v51, %v351_v12  ;;  %v398_v20 = vsel %vm365_vm4, %v348_v4, %v382_v14  ;;  %v349_v22 = vadd.f32 %v623_v43, %v326_v16  ;;  %v323_v23 = vld [vmem:[#allocation2 + $0x30] sm:$0xff]  ;;  %406 = vst.msk [vmem:[%s740_s4] sm:$0xff] %vm23_vm0, %v390_v19 }
  0xf5   :  { %v331_v24 = vld [vmem:[#allocation2 + $0x70] sm:$0xff]  ;;  %414 = vst.msk [vmem:[%s740_s4 + $0x40] sm:$0xff] %vm23_vm0, %v398_v20  ;;  %v393_v25 = vsel %vm360_vm5, %v343_v11, %v377_v17  ;;  %v346_v27 = vadd.f32 %v623_v43, %v323_v23  ;;  %vm358_vm7 = vcmp.ge.f32.partialorder %v341_v21, 0.0  ;;  %v375_v30 = vmul.f32 %v630_v51, %v341_v21 }
  0xf6   :  { %v401_v26 = vsel %vm368_vm6, %v351_v12, %v385_v18  ;;  %v354_v28 = vadd.f32 %v623_v43, %v331_v24  ;;  %409 = vst.msk [vmem:[%s740_s4 + $0x18] sm:$0xff] %vm23_vm0, %v393_v25  ;;  %vm366_vm8 = vcmp.ge.f32.partialorder %v349_v22, 0.0  ;;  %v383_v31 = vmul.f32 %v630_v51, %v349_v22  ;;  %v321_v32 = vld [vmem:[#allocation2 + $0x20] sm:$0xff] }
  0xf7   :  { %417 = vst.msk [vmem:[%s740_s4 + $0x58] sm:$0xff] %vm23_vm0, %v401_v26  ;;  %v329_v33 = vld [vmem:[#allocation2 + $0x60] sm:$0xff]  ;;  %vm363_vm9 = vcmp.ge.f32.partialorder %v346_v27, 0.0  ;;  %v380_v37 = vmul.f32 %v630_v51, %v346_v27  ;;  %v391_v39 = vsel %vm358_vm7, %v341_v21, %v375_v30  ;;  %v344_v41 = vadd.f32 %v623_v43, %v321_v32 }
  0xf8   :  { %vm371_vm10 = vcmp.ge.f32.partialorder %v354_v28, 0.0  ;;  %v388_v38 = vmul.f32 %v630_v51, %v354_v28  ;;  %v399_v40 = vsel %vm366_vm8, %v349_v22, %v383_v31  ;;  %v352_v42 = vadd.f32 %v623_v43, %v329_v33  ;;  %407 = vst.msk [vmem:[%s740_s4 + $0x8] sm:$0xff] %vm23_vm0, %v391_v39  ;;  %v324_v46 = vld [vmem:[#allocation2 + $0x38] sm:$0xff] }
  0xf9   :  { %415 = vst.msk [vmem:[%s740_s4 + $0x48] sm:$0xff] %vm23_vm0, %v399_v40  ;;  %v396_v44 = vsel %vm363_vm9, %v346_v27, %v380_v37  ;;  %v332_v47 = vld [vmem:[#allocation2 + $0x78] sm:$0xff]  ;;  %v286_v48 = vadd.f32 %v237_v34, %v45_v29  ;;  %v294_v49 = vadd.f32 %v269_v36, %v53_v35  ;;  %vm361_vm11 = vcmp.ge.f32.partialorder %v344_v41, 0.0 }
  0xfa   :  { %v404_v45 = vsel %vm371_vm10, %v354_v28, %v388_v38  ;;  %412 = vst.msk [vmem:[%s740_s4 + $0x30] sm:$0xff] %vm23_vm0, %v396_v44  ;;  %v378_v50 = vmul.f32 %v630_v51, %v344_v41  ;;  %vm369_vm12 = vcmp.ge.f32.partialorder %v352_v42, 0.0  ;;  %v386_v52 = vmul.f32 %v630_v51, %v352_v42 }
  0xfb   :  { %420 = vst.msk [vmem:[%s740_s4 + $0x70] sm:$0xff] %vm23_vm0, %v404_v45  ;;  %v347_v53 = vadd.f32 %v623_v43, %v324_v46  ;;  %v355_v54 = vadd.f32 %v623_v43, %v332_v47  ;;  %303 = vst.msk [vmem:[#allocation2 + $0x28] sm:$0xff] %vm23_vm0, %v286_v48 }
  0xfc   :  { %311 = vst.msk [vmem:[#allocation2 + $0x68] sm:$0xff] %vm23_vm0, %v294_v49  ;;  %v394_v55 = vsel %vm361_vm11, %v344_v41, %v378_v50  ;;  %v402_v56 = vsel %vm369_vm12, %v352_v42, %v386_v52 }
  0xfd   :  { %410 = vst.msk [vmem:[%s740_s4 + $0x20] sm:$0xff] %vm23_vm0, %v394_v55  ;;  %418 = vst.msk [vmem:[%s740_s4 + $0x60] sm:$0xff] %vm23_vm0, %v402_v56  ;;  %vm364_vm13 = vcmp.ge.f32.partialorder %v347_v53, 0.0  ;;  %v381_v57 = vmul.f32 %v630_v51, %v347_v53  ;;  %vm372_vm14 = vcmp.ge.f32.partialorder %v355_v54, 0.0  ;;  %v389_v58 = vmul.f32 %v630_v51, %v355_v54 }
  0xff   :  { %v397_v59 = vsel %vm364_vm13, %v347_v53, %v381_v57  ;;  %v405_v60 = vsel %vm372_vm14, %v355_v54, %v389_v58 }
 0x100   :  { %413 = vst.msk [vmem:[%s740_s4 + $0x38] sm:$0xff] %vm23_vm0, %v397_v59  ;;  %421 = vst.msk [vmem:[%s740_s4 + $0x78] sm:$0xff] %vm23_vm0, %v405_v60 }
 0x102   :  { %v322_v61 = vld [vmem:[#allocation2 + $0x28] sm:$0xff] }
 0x103   :  { %v330_v62 = vld [vmem:[#allocation2 + $0x68] sm:$0xff]  ;;  %v345_v63 = vadd.f32 %v623_v43, %v322_v61 }
 0x104   :  { %v353_v0 = vadd.f32 %v623_v43, %v330_v62 }
 0x105   :  { %vm362_vm15 = vcmp.ge.f32.partialorder %v345_v63, 0.0  ;;  %v379_v1 = vmul.f32 %v630_v51, %v345_v63 }
 0x106   :  { %vm370_vm1 = vcmp.ge.f32.partialorder %v353_v0, 0.0  ;;  %v387_v2 = vmul.f32 %v630_v51, %v353_v0 }
 0x107   :  { %v395_v3 = vsel %vm362_vm15, %v345_v63, %v379_v1 }
 0x108   :  { %v403_v4 = vsel %vm370_vm1, %v353_v0, %v387_v2  ;;  %411 = vst.msk [vmem:[%s740_s4 + $0x28] sm:$0xff] %vm23_vm0, %v395_v3 }
 0x109   :  { %419 = vst.msk [vmem:[%s740_s4 + $0x68] sm:$0xff] %vm23_vm0, %v403_v4 }

// kernel: ocdib_forward.5
= control target key start
LH: loop header
LB: loop body
LE: loop exit
PB: predicated region body
PF: predicated region fallthrough
CT: control target
= control target key end

     0   :  { %vm31_vm0 = vcmask 392192   ;;  %v1460_v1 = vmov 0.0   ;;  %s1462_s18 = smov 48   ;;  %s2034_s0 = inlined_call_operand.vmem [shape: bf16[128,48], index: 0, kind: input, shape index: {}]   ;;  %s2035_s1 = inlined_call_operand.vmem [shape: bf16[128,128], index: 1, kind: input, shape index: {}]   ;;  %s2036_s2 = inlined_call_operand.vmem [shape: f32[1,48], index: 2, kind: input, shape index: {}]   ;;  %s2037_s3 = inlined_call_operand.vmem [shape: f32[1,48], index: 3, kind: input, shape index: {}]   ;;  %s2038_s5 = inlined_call_operand.vmem [shape: bf16[24,3], index: 5, kind: input, shape index: {}]   ;;  %s2039_s4 = inlined_call_operand.vmem [shape: f32[128,24], index: 4, kind: input, shape index: {}]   ;;  %s2040_s6 = inlined_call_operand.vmem [shape: f32[1,3], index: 6, kind: input, shape index: {}]   ;;  %s2041_s7 = inlined_call_operand.vmem [shape: f32[128,128], index: 7, kind: output, shape index: {}]  }
   0x1   :  { %v1282_v0 = vld [vmem:[%s2034_s0 + $0x38] sm:$0xff]   ;;  %34 = vst.msk [vmem:[#allocation2 + $0x10] sm:$0xff] %vm31_vm0, %v1460_v1  ;;  %32 = vst.msk [vmem:[#allocation2] sm:$0xff] %vm31_vm0, %v1460_v1  ;;  %v1283_v2 = vld [vmem:[%s2034_s0 + $0x30] sm:$0xff]  }
   0x2   :  { %33 = vst.msk [vmem:[#allocation2 + $0x8] sm:$0xff] %vm31_vm0, %v1460_v1  ;;  %35 = vst.msk [vmem:[#allocation2 + $0x18] sm:$0xff] %vm31_vm0, %v1460_v1  ;;  %1225 = vmatprep.subr.bf16.mxu0 %v1282_v0  ;;  %v1284_v3 = vld [vmem:[%s2034_s0 + $0x28] sm:$0xff]   ;;  %v1285_v4 = vld [vmem:[%s2034_s0 + $0x20] sm:$0xff]  }
   0x3   :  { %36 = vst.msk [vmem:[#allocation2 + $0x20] sm:$0xff] %vm31_vm0, %v1460_v1  ;;  %37 = vst.msk [vmem:[#allocation2 + $0x28] sm:$0xff] %vm31_vm0, %v1460_v1  ;;  %1226 = vmatpush3.bf16.msra.mxu0 %v1282_v0  ;;  %v1290_v5 = vld [vmem:[%s2035_s1] sm:$0xff]   ;;  %v1286_v6 = vld [vmem:[%s2034_s0 + $0x18] sm:$0xff]  }
   0x4   :  { %38 = vst.msk [vmem:[#allocation2 + $0x30] sm:$0xff] %vm31_vm0, %v1460_v1  ;;  %39 = vst.msk [vmem:[#allocation2 + $0x38] sm:$0xff] %vm31_vm0, %v1460_v1  ;;  %1227 = vmatprep.subr.bf16.mxu0 %v1283_v2  ;;  %1241 = vmatprep.mubr.bf16.mxu0 %v1290_v5  ;;  %v1287_v7 = vld [vmem:[%s2034_s0 + $0x10] sm:$0xff]   ;;  %v1288_v8 = vld [vmem:[%s2034_s0 + $0x8] sm:$0xff]  }
   0x5   :  { %40 = vst.msk [vmem:[#allocation2 + $0x40] sm:$0xff] %vm31_vm0, %v1460_v1  ;;  %41 = vst.msk [vmem:[#allocation2 + $0x48] sm:$0xff] %vm31_vm0, %v1460_v1  ;;  %v1289_v9 = vld [vmem:[%s2034_s0] sm:$0xff]   ;;  %v1291_v10 = vld [vmem:[%s2035_s1 + $0x8] sm:$0xff]  }
   0x6   :  { %42 = vst.msk [vmem:[#allocation2 + $0x50] sm:$0xff] %vm31_vm0, %v1460_v1  ;;  %43 = vst.msk [vmem:[#allocation2 + $0x58] sm:$0xff] %vm31_vm0, %v1460_v1  ;;  %v1292_v11 = vld [vmem:[%s2035_s1 + $0x10] sm:$0xff]   ;;  %v1293_v12 = vld [vmem:[%s2035_s1 + $0x18] sm:$0xff]  }
   0x7   :  { %44 = vst.msk [vmem:[#allocation2 + $0x60] sm:$0xff] %vm31_vm0, %v1460_v1  ;;  %45 = vst.msk [vmem:[#allocation2 + $0x68] sm:$0xff] %vm31_vm0, %v1460_v1  ;;  %1228 = vmatpush3.bf16.msra.mxu0 %v1283_v2  ;;  %v1294_v13 = vld [vmem:[%s2035_s1 + $0x20] sm:$0xff]   ;;  %v1295_v14 = vld [vmem:[%s2035_s1 + $0x28] sm:$0xff]  }
   0x8   :  { %46 = vst.msk [vmem:[#allocation2 + $0x70] sm:$0xff] %vm31_vm0, %v1460_v1  ;;  %47 = vst.msk [vmem:[#allocation2 + $0x78] sm:$0xff] %vm31_vm0, %v1460_v1  ;;  %1229 = vmatprep.subr.bf16.mxu0 %v1284_v3  ;;  %v1296_v15 = vld [vmem:[%s2035_s1 + $0x30] sm:$0xff]   ;;  %v1297_v16 = vld [vmem:[%s2035_s1 + $0x38] sm:$0xff]  }
   0x9   :  { %v50_v17 = vld [vmem:[#allocation2 + $0x10] sm:$0xff]  ;;  %v48_v19 = vld [vmem:[#allocation2] sm:$0xff]  ;;  %v51_v22 = vld [vmem:[#allocation2 + $0x18] sm:$0xff] }
   0xa   :  { %v49_v25 = vld [vmem:[#allocation2 + $0x8] sm:$0xff]  ;;  %v1574_v30 = vld [vmem:[%s2036_s2] ss:$0 sm:$0xff]  ;;  %s1461_s2 = smov 104  }
   0xb   :  { %1230 = vmatpush3.bf16.msra.mxu0 %v1284_v3  ;;  %v54_v28 = vld [vmem:[#allocation2 + $0x30] sm:$0xff]  ;;  %v52_v32 = vld [vmem:[#allocation2 + $0x20] sm:$0xff]  ;;  %v55_v37 = vld [vmem:[#allocation2 + $0x38] sm:$0xff] }
   0xc   :  { %1231 = vmatprep.subr.bf16.mxu0 %v1285_v4  ;;  %v1580_v35 = vld [vmem:[%s2037_s3] ss:$0 sm:$0xff]  ;;  %v53_v42 = vld [vmem:[#allocation2 + $0x28] sm:$0xff] }
   0xd   :  { %v58_v48 = vld [vmem:[#allocation2 + $0x50] sm:$0xff]  ;;  %v56_v59 = vld [vmem:[#allocation2 + $0x40] sm:$0xff]  ;;  %v59_v1 = vld [vmem:[#allocation2 + $0x58] sm:$0xff] }
   0xf   :  { %1232 = vmatpush3.bf16.msra.mxu0 %v1285_v4 }
  0x10   :  { %1233 = vmatprep.subr.bf16.mxu0 %v1286_v6 }
  0x13   :  { %1234 = vmatpush3.bf16.msra.mxu0 %v1286_v6 }
  0x14   :  { %1235 = vmatprep.subr.bf16.mxu0 %v1287_v7 }
  0x17   :  { %1236 = vmatpush3.bf16.msra.mxu0 %v1287_v7 }
  0x18   :  { %1237 = vmatprep.subr.bf16.mxu0 %v1288_v8 }
  0x1b   :  { %1238 = vmatpush3.bf16.msra.mxu0 %v1288_v8  ;;  %v57_v8 = vld [vmem:[#allocation2 + $0x48] sm:$0xff] }
  0x1c   :  { %1239 = vmatprep.subr.bf16.mxu0 %v1289_v9 }
  0x1f   :  { %1240 = vmatpush3.bf16.msra.mxu0 %v1289_v9 }
  0x22   :  { %1242 = vmatmul.mubr.bf16.vlgmr.msra.gmra.mxu0 %v1291_v10 }
  0x23   :  { %1245 = vmatprep.mubr.bf16.mxu0 %v1292_v11 }
  0x2a   :  { %1246 = vmatmul.mubr.bf16.gmra.mxu0 %v1293_v12 }
  0x2b   :  { %1249 = vmatprep.mubr.bf16.mxu0 %v1294_v13 }
  0x32   :  { %1250 = vmatmul.mubr.bf16.gmra.mxu0 %v1295_v14 }
  0x33   :  { %1253 = vmatprep.mubr.bf16.mxu0 %v1296_v15 }
  0x3a   :  { %1254 = vmatmul.mubr.bf16.gmra.mxu0 %v1297_v16 }
  0xe2   :  { %v1243_v18 = vpop.f32.mrf.mxu0 }
  0xe3   :  { %v291_v20 = vadd.f32 %v1243_v18, %v50_v17  ;;  %v62_v17 = vld [vmem:[#allocation2 + $0x70] sm:$0xff] }
  0xe4   :  { %v226_v21 = vpop.f32.mrf.mxu0 }
  0xe5   :  { %308 = vst.msk [vmem:[#allocation2 + $0x10] sm:$0xff] %vm31_vm0, %v291_v20  ;;  %v289_v23 = vadd.f32 %v226_v21, %v48_v19 }
  0xe6   :  { %v1244_v24 = vpop.f32.mrf.mxu0 }
  0xe7   :  { %306 = vst.msk [vmem:[#allocation2] sm:$0xff] %vm31_vm0, %v289_v23  ;;  %v292_v26 = vadd.f32 %v1244_v24, %v51_v22  ;;  %v60_v24 = vld [vmem:[#allocation2 + $0x60] sm:$0xff] }
  0xe8   :  { %v229_v27 = vpop.f32.mrf.mxu0 }
  0xe9   :  { %309 = vst.msk [vmem:[#allocation2 + $0x18] sm:$0xff] %vm31_vm0, %v292_v26  ;;  %v290_v29 = vadd.f32 %v229_v27, %v49_v25 }
  0xea   :  { %v1247_v31 = vpop.f32.mrf.mxu0 }
  0xeb   :  { %307 = vst.msk [vmem:[#allocation2 + $0x8] sm:$0xff] %vm31_vm0, %v290_v29  ;;  %v295_v33 = vadd.f32 %v1247_v31, %v54_v28  ;;  %v63_v31 = vld [vmem:[#allocation2 + $0x78] sm:$0xff] }
  0xec   :  { %v327_v34 = vld [vmem:[#allocation2 + $0x10] sm:$0xff]  ;;  %v242_v36 = vpop.f32.mrf.mxu0 }
  0xed   :  { %v350_v38 = vadd.f32 %v1574_v30, %v327_v34  ;;  %312 = vst.msk [vmem:[#allocation2 + $0x30] sm:$0xff] %vm31_vm0, %v295_v33  ;;  %v293_v39 = vadd.f32 %v242_v36, %v52_v32 }
  0xee   :  { %v325_v40 = vld [vmem:[#allocation2] sm:$0xff]  ;;  %v1248_v41 = vpop.f32.mrf.mxu0 }
  0xef   :  { %v348_v43 = vadd.f32 %v1574_v30, %v325_v40  ;;  %310 = vst.msk [vmem:[#allocation2 + $0x20] sm:$0xff] %vm31_vm0, %v293_v39  ;;  %v296_v44 = vadd.f32 %v1248_v41, %v55_v37  ;;  %vm366_vm1 = vcmp.ge.f32.partialorder %v350_v38, 0.0  ;;  %v389_v45 = vmul.f32 %v1580_v35, %v350_v38  ;;  %v61_v40 = vld [vmem:[#allocation2 + $0x68] sm:$0xff] }
  0xf0   :  { %v328_v46 = vld [vmem:[#allocation2 + $0x18] sm:$0xff]  ;;  %v245_v47 = vpop.f32.mrf.mxu0 }
  0xf1   :  { %v351_v49 = vadd.f32 %v1574_v30, %v328_v46  ;;  %313 = vst.msk [vmem:[#allocation2 + $0x38] sm:$0xff] %vm31_vm0, %v296_v44  ;;  %v294_v50 = vadd.f32 %v245_v47, %v53_v42  ;;  %v1589_v51 = vsel %vm366_vm1, %v350_v38, %v389_v45  ;;  %v387_v55 = vmul.f32 %v1580_v35, %v348_v43 }
  0xf2   :  { %v326_v52 = vld [vmem:[#allocation2 + $0x8] sm:$0xff]  ;;  %v1251_v53 = vpop.f32.mrf.mxu0  ;;  %v1158_v54 = vmul.f32 -1.442695, %v1589_v51  ;;  %vm364_vm3 = vcmp.ge.f32.partialorder %v348_v43, 0.0 }
  0xf3   :  { %vm367_vm2 = vcmp.ge.f32.partialorder %v351_v49, 0.0  ;;  %v390_v56 = vmul.f32 %v1580_v35, %v351_v49  ;;  %v349_v57 = vadd.f32 %v1574_v30, %v326_v52  ;;  %311 = vst.msk [vmem:[#allocation2 + $0x28] sm:$0xff] %vm31_vm0, %v294_v50  ;;  %v299_v58 = vadd.f32 %v1251_v53, %v58_v48 }
  0xf4   :  { %v331_v60 = vld [vmem:[#allocation2 + $0x30] sm:$0xff]  ;;  %v258_v61 = vpop.f32.mrf.mxu0  ;;  %1300 = vpow2.f32 %v1158_v54  ;;  %v1605_v9 = vsel %vm364_vm3, %v348_v43, %v387_v55  ;;  %vm702_vm3 = vcmask 195584  }
  0xf5   :  { %v1596_v62 = vsel %vm367_vm2, %v351_v49, %v390_v56  ;;  %vm365_vm4 = vcmp.ge.f32.partialorder %v349_v57, 0.0  ;;  %v388_v63 = vmul.f32 %v1580_v35, %v349_v57  ;;  %v354_v0 = vadd.f32 %v1574_v30, %v331_v60  ;;  %316 = vst.msk [vmem:[#allocation2 + $0x50] sm:$0xff] %vm31_vm0, %v299_v58 }
  0xf6   :  { %v1159_v2 = vmul.f32 -1.442695, %v1596_v62  ;;  %v329_v3 = vld [vmem:[#allocation2 + $0x20] sm:$0xff]  ;;  %v297_v4 = vadd.f32 %v258_v61, %v56_v59  ;;  %v1252_v5 = vpop.f32.mrf.mxu0  ;;  %v1156_v32 = vmul.f32 -1.442695, %v1605_v9  ;;  %vm727_vm2 = vcmask 1043456  }
  0xf7   :  { %v1602_v6 = vsel %vm365_vm4, %v349_v57, %v388_v63  ;;  %v352_v7 = vadd.f32 %v1574_v30, %v329_v3  ;;  %v393_v11 = vmul.f32 %v1580_v35, %v354_v0  ;;  %v300_v13 = vadd.f32 %v1252_v5, %v59_v1 }
  0xf8   :  { %1302 = vpow2.f32 %v1159_v2  ;;  %v1157_v10 = vmul.f32 -1.442695, %v1602_v6  ;;  %v332_v12 = vld [vmem:[#allocation2 + $0x38] sm:$0xff]  ;;  %314 = vst.msk [vmem:[#allocation2 + $0x40] sm:$0xff] %vm31_vm0, %v297_v4  ;;  %v261_v14 = vpop.f32.mrf.mxu0  ;;  %vm370_vm5 = vcmp.ge.f32.partialorder %v354_v0, 0.0  ;;  %vm1084_vm4 = vcmask 588800  }
  0xf9   :  { %vm368_vm6 = vcmp.ge.f32.partialorder %v352_v7, 0.0  ;;  %v391_v15 = vmul.f32 %v1580_v35, %v352_v7  ;;  %v355_v16 = vadd.f32 %v1574_v30, %v332_v12  ;;  %317 = vst.msk [vmem:[#allocation2 + $0x58] sm:$0xff] %vm31_vm0, %v300_v13  ;;  %v298_v19 = vadd.f32 %v261_v14, %v57_v8 }
  0xfa   :  { %1304 = vpow2.f32 %v1157_v10  ;;  %v330_v18 = vld [vmem:[#allocation2 + $0x28] sm:$0xff]  ;;  %v1255_v20 = vpop.f32.mrf.mxu0  ;;  %v1617_v25 = vsel %vm370_vm5, %v354_v0, %v393_v11  ;;  %vm1101_vm5 = vcmask 613376  }
  0xfb   :  { %v1613_v21 = vsel %vm368_vm6, %v352_v7, %v391_v15  ;;  %vm371_vm7 = vcmp.ge.f32.partialorder %v355_v16, 0.0  ;;  %v394_v22 = vmul.f32 %v1580_v35, %v355_v16  ;;  %v353_v23 = vadd.f32 %v1574_v30, %v330_v18  ;;  %315 = vst.msk [vmem:[#allocation2 + $0x48] sm:$0xff] %vm31_vm0, %v298_v19 }
  0xfc   :  { %v1160_v26 = vmul.f32 -1.442695, %v1613_v21  ;;  %v335_v27 = vld [vmem:[#allocation2 + $0x50] sm:$0xff]  ;;  %v303_v28 = vadd.f32 %v1255_v20, %v62_v17  ;;  %v274_v29 = vpop.f32.mrf.mxu0  ;;  %v1162_v41 = vmul.f32 -1.442695, %v1617_v25 }
  0xfd   :  { %v1622_v33 = vsel %vm371_vm7, %v355_v16, %v394_v22  ;;  %vm369_vm8 = vcmp.ge.f32.partialorder %v353_v23, 0.0  ;;  %v392_v34 = vmul.f32 %v1580_v35, %v353_v23  ;;  %v358_v36 = vadd.f32 %v1574_v30, %v335_v27 }
  0xfe   :  { %1306 = vpow2.f32 %v1160_v26  ;;  %v1163_v37 = vmul.f32 -1.442695, %v1622_v33  ;;  %320 = vst.msk [vmem:[#allocation2 + $0x70] sm:$0xff] %vm31_vm0, %v303_v28  ;;  %v301_v38 = vadd.f32 %v274_v29, %v60_v24  ;;  %v1256_v39 = vpop.f32.mrf.mxu0 }
  0xff   :  { %v1629_v42 = vsel %vm369_vm8, %v353_v23, %v392_v34  ;;  %v333_v43 = vld [vmem:[#allocation2 + $0x40] sm:$0xff]  ;;  %v304_v44 = vadd.f32 %v1256_v39, %v63_v31  ;;  %v397_v46 = vmul.f32 %v1580_v35, %v358_v36  ;;  %vm374_vm9 = vcmp.ge.f32.partialorder %v358_v36, 0.0 }
 0x100   :  { %1308 = vpow2.f32 %v1163_v37  ;;  %v1161_v45 = vmul.f32 -1.442695, %v1629_v42  ;;  %v356_v47 = vadd.f32 %v1574_v30, %v333_v43  ;;  %318 = vst.msk [vmem:[#allocation2 + $0x60] sm:$0xff] %vm31_vm0, %v301_v38  ;;  %v277_v48 = vpop.f32.mrf.mxu0  ;;  %v336_v50 = vld [vmem:[#allocation2 + $0x58] sm:$0xff] }
 0x101   :  { %v1301_v49 = vpop.eup %1300  ;;  %321 = vst.msk [vmem:[#allocation2 + $0x78] sm:$0xff] %vm31_vm0, %v304_v44  ;;  %v302_v52 = vadd.f32 %v277_v48, %v61_v40  ;;  %1310 = vpow2.f32 %v1156_v32  ;;  %v359_v54 = vadd.f32 %v1574_v30, %v336_v50  ;;  %v1639_v57 = vsel %vm374_vm9, %v358_v36, %v397_v46 }
 0x102   :  { %1312 = vpow2.f32 %v1161_v45  ;;  %vm372_vm10 = vcmp.ge.f32.partialorder %v356_v47, 0.0  ;;  %v395_v53 = vmul.f32 %v1580_v35, %v356_v47  ;;  %v334_v55 = vld [vmem:[#allocation2 + $0x48] sm:$0xff]  ;;  %v469_v56 = vadd.f32 1.0, %v1301_v49 }
 0x103   :  { %319 = vst.msk [vmem:[#allocation2 + $0x68] sm:$0xff] %vm31_vm0, %v302_v52  ;;  %1314 = vpow2.f32 %v1162_v41  ;;  %v357_v59 = vadd.f32 %v1574_v30, %v334_v55  ;;  %vm375_vm11 = vcmp.ge.f32.partialorder %v359_v54, 0.0  ;;  %v398_v63 = vmul.f32 %v1580_v35, %v359_v54 }
 0x104   :  { %v1641_v58 = vsel %vm372_vm10, %v356_v47, %v395_v53  ;;  %1316 = vrcp.f32 %v469_v56  ;;  %v1166_v8 = vmul.f32 -1.442695, %v1639_v57 }
 0x105   :  { %v1303_v60 = vpop.eup %1302  ;;  %v1164_v61 = vmul.f32 -1.442695, %v1641_v58  ;;  %v339_v0 = vld [vmem:[#allocation2 + $0x70] sm:$0xff]  ;;  %vm373_vm12 = vcmp.ge.f32.partialorder %v357_v59, 0.0  ;;  %v396_v1 = vmul.f32 %v1580_v35, %v357_v59  ;;  %v1648_v5 = vsel %vm375_vm11, %v359_v54, %v398_v63 }
 0x106   :  { %v362_v2 = vadd.f32 %v1574_v30, %v339_v0  ;;  %v470_v3 = vadd.f32 1.0, %v1303_v60  ;;  %v1167_v10 = vmul.f32 -1.442695, %v1648_v5 }
 0x107   :  { %v1305_v4 = vpop.eup %1304  ;;  %1318 = vpow2.f32 %v1164_v61  ;;  %v337_v7 = vld [vmem:[#allocation2 + $0x60] sm:$0xff]  ;;  %v1652_v11 = vsel %vm373_vm12, %v357_v59, %v396_v1 }
 0x108   :  { %v401_v12 = vmul.f32 %v1580_v35, %v362_v2  ;;  %v340_v13 = vld [vmem:[#allocation2 + $0x78] sm:$0xff]  ;;  %v1165_v14 = vmul.f32 -1.442695, %v1652_v11  ;;  %v360_v15 = vadd.f32 %v1574_v30, %v337_v7  ;;  %1320 = vrcp.f32 %v470_v3 }
 0x109   :  { %v363_v16 = vadd.f32 %v1574_v30, %v340_v13  ;;  %1322 = vpow2.f32 %v1167_v10  ;;  %vm378_vm13 = vcmp.ge.f32.partialorder %v362_v2, 0.0  ;;  %v468_v18 = vadd.f32 1.0, %v1305_v4 }
 0x10a   :  { %v338_v17 = vld [vmem:[#allocation2 + $0x68] sm:$0xff]  ;;  %1324 = vpow2.f32 %v1165_v14  ;;  %vm376_vm14 = vcmp.ge.f32.partialorder %v360_v15, 0.0  ;;  %v399_v20 = vmul.f32 %v1580_v35, %v360_v15  ;;  %v1661_v26 = vsel %vm378_vm13, %v362_v2, %v401_v12 }
 0x10b   :  { %v1307_v19 = vpop.eup %1306  ;;  %1326 = vpow2.f32 %v1166_v8  ;;  %vm379_vm15 = vcmp.ge.f32.partialorder %v363_v16, 0.0  ;;  %v402_v22 = vmul.f32 %v1580_v35, %v363_v16  ;;  %v361_v23 = vadd.f32 %v1574_v30, %v338_v17 }
 0x10c   :  { %v1663_v27 = vsel %vm376_vm14, %v360_v15, %v399_v20  ;;  %1328 = vrcp.f32 %v468_v18  ;;  %v471_v28 = vadd.f32 1.0, %v1307_v19  ;;  %v1170_v30 = vmul.f32 -1.442695, %v1661_v26 }
 0x10d   :  { %v1309_v24 = vpop.eup %1308  ;;  %v1168_v31 = vmul.f32 -1.442695, %v1663_v27  ;;  %v1666_v32 = vsel %vm379_vm15, %v363_v16, %v402_v22  ;;  %vm377_vm1 = vcmp.ge.f32.partialorder %v361_v23, 0.0  ;;  %v400_v34 = vmul.f32 %v1580_v35, %v361_v23 }
 0x10e   :  { %v1311_v29 = vpop.eup %1310  ;;  %v1171_v37 = vmul.f32 -1.442695, %v1666_v32  ;;  %1330 = vrcp.f32 %v471_v28  ;;  %v474_v45 = vadd.f32 1.0, %v1309_v24 }
 0x10f   :  { %v1313_v36 = vpop.eup %1312  ;;  %v467_v38 = vadd.f32 1.0, %v1311_v29  ;;  %1332 = vpow2.f32 %v1168_v31  ;;  %v1671_v39 = vsel %vm377_vm1, %v361_v23, %v400_v34 }
 0x110   :  { %v1315_v40 = vpop.eup %1314  ;;  %1334 = vpow2.f32 %v1171_v37  ;;  %v1169_v41 = vmul.f32 -1.442695, %v1671_v39  ;;  %v472_v43 = vadd.f32 1.0, %v1313_v36 }
 0x111   :  { %v1674_v44 = vpop.eup %1316  ;;  %1336 = vrcp.f32 %v467_v38  ;;  %v473_v47 = vadd.f32 1.0, %v1315_v40  ;;  %v1298_v38 = vld [vmem:[%s2038_s5 + $0x8] ss:$0 sps:$4 sm:$0xff]  }
 0x112   :  { %1338 = vpow2.f32 %v1169_v41  ;;  %v533_v35 = vmul.f32 0.5, %v1674_v44  ;;  %1277 = vmatprep.subr.msk.bf16.mxu1 %vm727_vm2, %v1298_v38 }
 0x113   :  { %1340 = vpow2.f32 %v1170_v30 }
 0x114   :  { %v1319_v46 = vpop.eup %1318  ;;  %v551_v48 = vmul.f32 1.442695, %v533_v35  ;;  %1342 = vrcp.f32 %v472_v43  ;;  %v729_v43 = vsel %vm727_vm2, %v1298_v38, 0 }
 0x115   :  { %v475_v49 = vadd.f32 1.0, %v1319_v46  ;;  %v1677_v50 = vpop.eup %1320  ;;  %1344 = vrcp.f32 %v474_v45  ;;  %1258 = vmatpush3.bf16.msra.mxu1 %v729_v43  ;;  %v1299_v46 = vld [vmem:[%s2038_s5] sm:$0xff]  }
 0x116   :  { %v1323_v52 = vpop.eup %1322  ;;  %1346 = vpow2.f32 %v551_v48  ;;  %v534_v53 = vmul.f32 0.5, %v1677_v50  ;;  %1259 = vmatprep.subr.bf16.mxu1 %v1299_v46 }
 0x117   :  { %v1325_v54 = vpop.eup %1324  ;;  %1348 = vrcp.f32 %v473_v47  ;;  %v478_v55 = vadd.f32 1.0, %v1323_v52 }
 0x118   :  { %v1327_v56 = vpop.eup %1326  ;;  %v553_v59 = vmul.f32 1.442695, %v534_v53  ;;  %1350 = vrcp.f32 %v475_v49  ;;  %v476_v60 = vadd.f32 1.0, %v1325_v54 }
 0x119   :  { %v1680_v61 = vpop.eup %1328  ;;  %1352 = vrcp.f32 %v478_v55  ;;  %v477_v0 = vadd.f32 1.0, %v1327_v56  ;;  %1260 = vmatpush3.bf16.msra.mxu1 %v1299_v46 }
 0x11a   :  { %1354 = vpow2.f32 %v553_v59  ;;  %v532_v3 = vmul.f32 0.5, %v1680_v61 }
 0x11b   :  { %v1682_v63 = vpop.eup %1330  ;;  %1356 = vrcp.f32 %v476_v60 }
 0x11c   :  { %v1333_v1 = vpop.eup %1332  ;;  %1358 = vrcp.f32 %v477_v0  ;;  %v549_v17 = vmul.f32 1.442695, %v532_v3  ;;  %v535_v18 = vmul.f32 0.5, %v1682_v63 }
 0x11d   :  { %v1335_v2 = vpop.eup %1334  ;;  %v479_v4 = vadd.f32 1.0, %v1333_v1 }
 0x11e   :  { %v1685_v7 = vpop.eup %1336  ;;  %v482_v8 = vadd.f32 1.0, %v1335_v2  ;;  %v555_v34 = vmul.f32 1.442695, %v535_v18 }
 0x11f   :  { %v1339_v10 = vpop.eup %1338  ;;  %v531_v12 = vmul.f32 0.5, %v1685_v7  ;;  %1360 = vrcp.f32 %v479_v4 }
 0x120   :  { %v1341_v13 = vpop.eup %1340  ;;  %v480_v14 = vadd.f32 1.0, %v1339_v10  ;;  %1362 = vrcp.f32 %v482_v8 }
 0x121   :  { %v1688_v15 = vpop.eup %1342  ;;  %v547_v16 = vmul.f32 1.442695, %v531_v12  ;;  %v481_v24 = vadd.f32 1.0, %v1341_v13 }
 0x122   :  { %v1691_v19 = vpop.eup %1344  ;;  %v536_v20 = vmul.f32 0.5, %v1688_v15  ;;  %1364 = vrcp.f32 %v480_v14 }
 0x123   :  { %v1347_v22 = vpop.eup %1346  ;;  %1366 = vpow2.f32 %v547_v16  ;;  %v538_v23 = vmul.f32 0.5, %v1691_v19 }
 0x124   :  { %v1695_v28 = vpop.eup %1348  ;;  %599 = vrot.lane.b32.xlu1 %v1347_v22, %s1461_s2  ;;  %v557_v29 = vmul.f32 1.442695, %v536_v20  ;;  %1368 = vpow2.f32 %v549_v17 }
 0x125   :  { %v1698_v31 = vpop.eup %1350  ;;  %v561_v36 = vmul.f32 1.442695, %v538_v23  ;;  %v537_v40 = vmul.f32 0.5, %v1695_v28 }
 0x126   :  { %v1700_v37 = vpop.eup %1352  ;;  %1370 = vpow2.f32 %v557_v29  ;;  %v539_v45 = vmul.f32 0.5, %v1698_v31 }
 0x127   :  { %v1355_v30 = vpop.eup %1354  ;;  %1372 = vrcp.f32 %v481_v24  ;;  %v542_v47 = vmul.f32 0.5, %v1700_v37  ;;  %v559_v48 = vmul.f32 1.442695, %v537_v40 }
 0x128   :  { %v1706_v41 = vpop.eup %1356  ;;  %601 = vrot.lane.b32.xlu1 %v1355_v30, %s1461_s2  ;;  %1374 = vpow2.f32 %v555_v34  ;;  %v563_v54 = vmul.f32 1.442695, %v539_v45  ;;  %v517_v45 = vld [vmem:[%s2039_s4 + $0x10] sm:$0xff] }
 0x129   :  { %v540_v35 = vmul.f32 0.5, %v1706_v41  ;;  %1376 = vpow2.f32 %v561_v36  ;;  %v1715_v52 = vpop.eup %1358  ;;  %v569_v56 = vmul.f32 1.442695, %v542_v47  ;;  %v518_v47 = vld [vmem:[%s2039_s4 + $0x18] sm:$0xff] }
 0x12a   :  { %v541_v60 = vmul.f32 0.5, %v1715_v52 }
 0x12b   :  { %v565_v49 = vmul.f32 1.442695, %v540_v35 }
 0x12c   :  { %v1717_v53 = vpop.eup %1360  ;;  %v567_v12 = vmul.f32 1.442695, %v541_v60  ;;  %v515_v60 = vld [vmem:[%s2039_s4] sm:$0xff] }
 0x12d   :  { %1378 = vpow2.f32 %v565_v49  ;;  %v1719_v55 = vpop.eup %1362  ;;  %v543_v2 = vmul.f32 0.5, %v1717_v53 }
 0x12e   :  { %1380 = vpow2.f32 %v559_v48  ;;  %v546_v8 = vmul.f32 0.5, %v1719_v55 }
 0x12f   :  { %v1721_v59 = vpop.eup %1364  ;;  %1382 = vpow2.f32 %v563_v54  ;;  %v571_v14 = vmul.f32 1.442695, %v543_v2  ;;  %v516_v2 = vld [vmem:[%s2039_s4 + $0x8] sm:$0xff] }
 0x130   :  { %v1367_v0 = vpop.eup %1366  ;;  %v544_v1 = vmul.f32 0.5, %v1721_v59  ;;  %1384 = vpow2.f32 %v569_v56  ;;  %v577_v17 = vmul.f32 1.442695, %v546_v8 }
 0x131   :  { %595 = vrot.lane.b32.xlu0 %v1367_v0, %s1461_s2  ;;  %v1369_v3 = vpop.eup %1368 }
 0x132   :  { %v573_v4 = vmul.f32 1.442695, %v544_v1 }
 0x133   :  { %v1371_v10 = vpop.eup %1370 }
 0x134   :  { %v1728_v13 = vpop.eup %1372  ;;  %605 = vrot.lane.b32.xlu1 %v1371_v10, %s1461_s2  ;;  %1386 = vpow2.f32 %v573_v4 }
 0x135   :  { %597 = vrot.lane.b32.xlu0 %v1369_v3, %s1461_s2  ;;  %v1375_v16 = vpop.eup %1374  ;;  %1388 = vpow2.f32 %v567_v12  ;;  %v545_v20 = vmul.f32 0.5, %v1728_v13  ;;  %v520_v3 = vld [vmem:[%s2039_s4 + $0x28] sm:$0xff] }
 0x136   :  { %v1377_v18 = vpop.eup %1376  ;;  %1390 = vpow2.f32 %v571_v14 }
 0x137   :  { %1392 = vpow2.f32 %v577_v17  ;;  %v575_v23 = vmul.f32 1.442695, %v545_v20  ;;  %v519_v17 = vld [vmem:[%s2039_s4 + $0x20] sm:$0xff] }
 0x138   :  { %609 = vrot.lane.b32.xlu1 %v1377_v18, %s1461_s2 }
 0x139   :  { %603 = vrot.lane.b32.xlu0 %v1375_v16, %s1461_s2  ;;  %1394 = vpow2.f32 %v575_v23  ;;  %v522_v16 = vld [vmem:[%s2039_s4 + $0x38] sm:$0xff] }
 0x13a   :  { %v1379_v22 = vpop.eup %1378 }
 0x13b   :  { %v1381_v24 = vpop.eup %1380 }
 0x13c   :  { %613 = vrot.lane.b32.xlu1 %v1379_v22, %s1461_s2  ;;  %v1383_v29 = vpop.eup %1382 }
 0x13d   :  { %607 = vrot.lane.b32.xlu0 %v1381_v24, %s1461_s2  ;;  %v1385_v34 = vpop.eup %1384 }
 0x140   :  { %617 = vrot.lane.b32.xlu1 %v1385_v34, %s1461_s2 }
 0x141   :  { %v1387_v36 = vpop.eup %1386  ;;  %611 = vrot.lane.b32.xlu0 %v1383_v29, %s1461_s2 }
 0x142   :  { %v1389_v38 = vpop.eup %1388 }
 0x143   :  { %v1391_v30 = vpop.eup %1390 }
 0x144   :  { %621 = vrot.lane.b32.xlu1 %v1387_v36, %s1461_s2  ;;  %v1393_v40 = vpop.eup %1392 }
 0x145   :  { %615 = vrot.lane.b32.xlu0 %v1389_v38, %s1461_s2  ;;  %v521_v38 = vld [vmem:[%s2039_s4 + $0x30] sm:$0xff] }
 0x146   :  { %v1395_v43 = vpop.eup %1394 }
 0x148   :  { %625 = vrot.lane.b32.xlu1 %v1393_v40, %s1461_s2  ;;  %v524_v40 = vld [vmem:[%s2039_s4 + $0x48] sm:$0xff] }
 0x149   :  { %619 = vrot.lane.b32.xlu0 %v1391_v30, %s1461_s2 }
 0x14d   :  { %623 = vrot.lane.b32.xlu0 %v1395_v43, %s1461_s2 }
 0x196   :  { %v600_v35 = vpop.permute.xlu1 %599 }
 0x197   :  { %v645_v46 = vmul.f32 %v600_v35, %v517_v45 }
 0x199   :  { %v661_v48 = vadd.f32 %v645_v46, %v1589_v51 }
 0x19a   :  { %v602_v49 = vpop.permute.xlu1 %601 }
 0x19b   :  { %v646_v54 = vmul.f32 %v602_v49, %v518_v47  ;;  %944 = vrot.lane.b32.xlu0 %v661_v48, %s1462_s18  ;;  %v526_v49 = vld [vmem:[%s2039_s4 + $0x58] sm:$0xff] }
 0x19d   :  { %v662_v56 = vadd.f32 %v646_v54, %v1596_v62  ;;  %v523_v54 = vld [vmem:[%s2039_s4 + $0x40] sm:$0xff] }
 0x19f   :  { %946 = vrot.lane.b32.xlu1 %v662_v56, %s1462_s18  ;;  %v676_v36 = vpack.c.bf16 %v662_v56, %v661_v48 }
 0x1a3   :  { %v596_v0 = vpop.permute.xlu0 %595 }
 0x1a4   :  { %v643_v1 = vmul.f32 %v596_v0, %v515_v60 }
 0x1a6   :  { %v659_v4 = vadd.f32 %v643_v1, %v1605_v9  ;;  %v606_v8 = vpop.permute.xlu1 %605 }
 0x1a7   :  { %v598_v10 = vpop.permute.xlu0 %597  ;;  %v648_v14 = vmul.f32 %v606_v8, %v520_v3  ;;  %v525_v8 = vld [vmem:[%s2039_s4 + $0x50] sm:$0xff] }
 0x1a8   :  { %v644_v12 = vmul.f32 %v598_v10, %v516_v2  ;;  %940 = vrot.lane.b32.xlu0 %v659_v4, %s1462_s18 }
 0x1a9   :  { %v664_v34 = vadd.f32 %v648_v14, %v1629_v42 }
 0x1aa   :  { %v660_v18 = vadd.f32 %v644_v12, %v1602_v6  ;;  %v610_v20 = vpop.permute.xlu1 %609  ;;  %v528_v12 = vld [vmem:[%s2039_s4 + $0x68] sm:$0xff] }
 0x1ab   :  { %v604_v22 = vpop.permute.xlu0 %603  ;;  %v650_v23 = vmul.f32 %v610_v20, %v522_v16 }
 0x1ac   :  { %v647_v24 = vmul.f32 %v604_v22, %v519_v17  ;;  %v675_v29 = vpack.c.bf16 %v660_v18, %v659_v4  ;;  %942 = vrot.lane.b32.xlu1 %v660_v18, %s1462_s18 }
 0x1ad   :  { %v666_v30 = vadd.f32 %v650_v23, %v1622_v33  ;;  %v530_v23 = vld [vmem:[%s2039_s4 + $0x78] sm:$0xff] }
 0x1ae   :  { %v663_v43 = vadd.f32 %v647_v24, %v1613_v21  ;;  %1261 = vmatprep.mubr.msk.bf16.mxu1 %vm702_vm3, %v675_v29  ;;  %v614_v45 = vpop.permute.xlu1 %613  ;;  %v527_v24 = vld [vmem:[%s2039_s4 + $0x60] sm:$0xff] }
 0x1af   :  { %1262 = vmatmul.mubr.msk.bf16.vlgmr.msra.gmra.mxu1 %vm702_vm3, %v676_v36  ;;  %v608_v35 = vpop.permute.xlu0 %607  ;;  %v652_v48 = vmul.f32 %v614_v45, %v524_v40  ;;  %v529_v45 = vld [vmem:[%s2039_s4 + $0x70] sm:$0xff] }
 0x1b0   :  { %v649_v46 = vmul.f32 %v608_v35, %v521_v38  ;;  %v677_v47 = vpack.c.bf16 %v664_v34, %v663_v43  ;;  %954 = vrot.lane.b32.xlu1 %v666_v30, %s1462_s18 }
 0x1b1   :  { %v668_v4 = vadd.f32 %v652_v48, %v1652_v11 }
 0x1b2   :  { %v665_v56 = vadd.f32 %v649_v46, %v1617_v25  ;;  %1265 = vmatprep.mubr.msk.bf16.mxu1 %vm702_vm3, %v677_v47  ;;  %v618_v60 = vpop.permute.xlu1 %617 }
 0x1b3   :  { %v612_v0 = vpop.permute.xlu0 %611  ;;  %v654_v1 = vmul.f32 %v618_v60, %v526_v49  ;;  %v1835_v60 = vld [vmem:[%s2040_s6] ss:$0 sm:$0xff]  ;;  %s1463_s6 = smov 72  }
 0x1b4   :  { %v678_v2 = vpack.c.bf16 %v666_v30, %v665_v56  ;;  %v651_v3 = vmul.f32 %v612_v0, %v523_v54  ;;  %952 = vrot.lane.b32.xlu0 %v665_v56, %s1462_s18  ;;  %950 = vrot.lane.b32.xlu1 %v664_v34, %s1462_s18 }
 0x1b5   :  { %v670_v10 = vadd.f32 %v654_v1, %v1648_v5 }
 0x1b6   :  { %v667_v14 = vadd.f32 %v651_v3, %v1641_v58  ;;  %v622_v16 = vpop.permute.xlu1 %621 }
 0x1b7   :  { %v616_v17 = vpop.permute.xlu0 %615  ;;  %1266 = vmatmul.mubr.msk.bf16.gmra.mxu1 %vm702_vm3, %v678_v2  ;;  %v656_v22 = vmul.f32 %v622_v16, %v528_v12 }
 0x1b8   :  { %v653_v18 = vmul.f32 %v616_v17, %v525_v8  ;;  %v679_v20 = vpack.c.bf16 %v668_v4, %v667_v14  ;;  %948 = vrot.lane.b32.xlu0 %v663_v43, %s1462_s18  ;;  %962 = vrot.lane.b32.xlu1 %v670_v10, %s1462_s18 }
 0x1b9   :  { %v672_v43 = vadd.f32 %v656_v22, %v1671_v39 }
 0x1ba   :  { %v669_v29 = vadd.f32 %v653_v18, %v1639_v57  ;;  %1269 = vmatprep.mubr.msk.bf16.mxu1 %vm702_vm3, %v679_v20  ;;  %v626_v34 = vpop.permute.xlu1 %625 }
 0x1bb   :  { %v620_v36 = vpop.permute.xlu0 %619  ;;  %v658_v38 = vmul.f32 %v626_v34, %v530_v23 }
 0x1bc   :  { %v680_v30 = vpack.c.bf16 %v670_v10, %v669_v29  ;;  %v655_v40 = vmul.f32 %v620_v36, %v527_v24  ;;  %960 = vrot.lane.b32.xlu0 %v669_v29, %s1462_s18  ;;  %958 = vrot.lane.b32.xlu1 %v668_v4, %s1462_s18 }
 0x1bd   :  { %v674_v35 = vadd.f32 %v658_v38, %v1666_v32 }
 0x1be   :  { %v671_v46 = vadd.f32 %v655_v40, %v1663_v27 }
 0x1bf   :  { %v624_v47 = vpop.permute.xlu0 %623  ;;  %1270 = vmatmul.mubr.msk.bf16.gmra.mxu1 %vm702_vm3, %v680_v30 }
 0x1c0   :  { %v657_v48 = vmul.f32 %v624_v47, %v529_v45  ;;  %v681_v49 = vpack.c.bf16 %v672_v43, %v671_v46  ;;  %956 = vrot.lane.b32.xlu0 %v667_v14, %s1462_s18  ;;  %970 = vrot.lane.b32.xlu1 %v674_v35, %s1462_s18 }
 0x1c2   :  { %v673_v54 = vadd.f32 %v657_v48, %v1661_v26  ;;  %1273 = vmatprep.mubr.msk.bf16.mxu1 %vm702_vm3, %v681_v49 }
 0x1c4   :  { %v682_v56 = vpack.c.bf16 %v674_v35, %v673_v54  ;;  %968 = vrot.lane.b32.xlu0 %v673_v54, %s1462_s18  ;;  %966 = vrot.lane.b32.xlu1 %v672_v43, %s1462_s18 }
 0x1c7   :  { %1274 = vmatmul.mubr.msk.bf16.gmra.mxu1 %vm702_vm3, %v682_v56 }
 0x1c8   :  { %964 = vrot.lane.b32.xlu0 %v671_v46, %s1462_s18 }
 0x26f   :  { %v1263_v0 = vpop.f32.mrf.mxu1 }
 0x270   :  { %v774_v1 = vadd.f32 %v1263_v0, %v1835_v60 }
 0x271   :  { %v765_v2 = vpop.f32.mrf.mxu1 }
 0x272   :  { %v1185_v3 = vmul.f32 -1.442695, %v774_v1  ;;  %v766_v4 = vadd.f32 %v1835_v60, %v765_v2 }
 0x273   :  { %v1264_v8 = vpop.f32.mrf.mxu1 }
 0x274   :  { %1396 = vpow2.f32 %v1185_v3  ;;  %v1183_v10 = vmul.f32 -1.442695, %v766_v4  ;;  %v777_v12 = vadd.f32 %v1264_v8, %v1835_v60 }
 0x275   :  { %v768_v14 = vpop.f32.mrf.mxu1 }
 0x276   :  { %1398 = vpow2.f32 %v1183_v10  ;;  %v1186_v16 = vmul.f32 -1.442695, %v777_v12  ;;  %v769_v17 = vadd.f32 %v1835_v60, %v768_v14 }
 0x277   :  { %v1267_v18 = vpop.f32.mrf.mxu1 }
 0x278   :  { %1400 = vpow2.f32 %v1186_v16  ;;  %v1184_v20 = vmul.f32 -1.442695, %v769_v17  ;;  %v790_v22 = vadd.f32 %v1267_v18, %v1835_v60 }
 0x279   :  { %v781_v23 = vpop.f32.mrf.mxu1 }
 0x27a   :  { %1402 = vpow2.f32 %v1184_v20  ;;  %v1189_v24 = vmul.f32 -1.442695, %v790_v22  ;;  %v782_v29 = vadd.f32 %v1835_v60, %v781_v23 }
 0x27b   :  { %v1268_v34 = vpop.f32.mrf.mxu1 }
 0x27c   :  { %1404 = vpow2.f32 %v1189_v24  ;;  %v1187_v36 = vmul.f32 -1.442695, %v782_v29  ;;  %v793_v38 = vadd.f32 %v1268_v34, %v1835_v60 }
 0x27d   :  { %v784_v30 = vpop.f32.mrf.mxu1 }
 0x27e   :  { %1406 = vpow2.f32 %v1187_v36  ;;  %v1190_v40 = vmul.f32 -1.442695, %v793_v38  ;;  %v785_v43 = vadd.f32 %v1835_v60, %v784_v30 }
 0x27f   :  { %v1271_v45 = vpop.f32.mrf.mxu1 }
 0x280   :  { %1408 = vpow2.f32 %v1190_v40  ;;  %v1188_v35 = vmul.f32 -1.442695, %v785_v43  ;;  %v806_v46 = vadd.f32 %v1271_v45, %v1835_v60 }
 0x281   :  { %v1397_v47 = vpop.eup %1396  ;;  %v797_v48 = vpop.f32.mrf.mxu1 }
 0x282   :  { %v878_v49 = vadd.f32 1.0, %v1397_v47  ;;  %1410 = vpow2.f32 %v1188_v35  ;;  %v1193_v54 = vmul.f32 -1.442695, %v806_v46  ;;  %v798_v56 = vadd.f32 %v1835_v60, %v797_v48 }
 0x283   :  { %v1399_v0 = vpop.eup %1398  ;;  %v1272_v1 = vpop.f32.mrf.mxu1 }
 0x284   :  { %1412 = vrcp.f32 %v878_v49  ;;  %v876_v2 = vadd.f32 1.0, %v1399_v0  ;;  %v1191_v3 = vmul.f32 -1.442695, %v798_v56  ;;  %v809_v4 = vadd.f32 %v1272_v1, %v1835_v60 }
 0x285   :  { %v1401_v8 = vpop.eup %1400  ;;  %1414 = vpow2.f32 %v1193_v54  ;;  %v800_v10 = vpop.f32.mrf.mxu1 }
 0x286   :  { %1416 = vrcp.f32 %v876_v2  ;;  %v879_v12 = vadd.f32 1.0, %v1401_v8  ;;  %v1194_v14 = vmul.f32 -1.442695, %v809_v4  ;;  %v801_v16 = vadd.f32 %v1835_v60, %v800_v10 }
 0x287   :  { %v1403_v17 = vpop.eup %1402  ;;  %1418 = vpow2.f32 %v1191_v3  ;;  %v1275_v18 = vpop.f32.mrf.mxu1 }
 0x288   :  { %1420 = vrcp.f32 %v879_v12  ;;  %v877_v20 = vadd.f32 1.0, %v1403_v17  ;;  %v1192_v22 = vmul.f32 -1.442695, %v801_v16  ;;  %v822_v23 = vadd.f32 %v1275_v18, %v1835_v60 }
 0x289   :  { %v1405_v24 = vpop.eup %1404  ;;  %1422 = vpow2.f32 %v1194_v14  ;;  %v813_v29 = vpop.f32.mrf.mxu1 }
 0x28a   :  { %1424 = vrcp.f32 %v877_v20  ;;  %v882_v34 = vadd.f32 1.0, %v1405_v24  ;;  %v1197_v36 = vmul.f32 -1.442695, %v822_v23  ;;  %v814_v38 = vadd.f32 %v1835_v60, %v813_v29 }
 0x28b   :  { %v1407_v30 = vpop.eup %1406  ;;  %1426 = vpow2.f32 %v1192_v22  ;;  %v1276_v40 = vpop.f32.mrf.mxu1 }
 0x28c   :  { %1428 = vrcp.f32 %v882_v34  ;;  %v880_v43 = vadd.f32 1.0, %v1407_v30  ;;  %v1195_v45 = vmul.f32 -1.442695, %v814_v38  ;;  %v825_v35 = vadd.f32 %v1276_v40, %v1835_v60 }
 0x28d   :  { %v1409_v46 = vpop.eup %1408  ;;  %1430 = vpow2.f32 %v1197_v36  ;;  %v816_v47 = vpop.f32.mrf.mxu1 }
 0x28e   :  { %1432 = vrcp.f32 %v880_v43  ;;  %v883_v48 = vadd.f32 1.0, %v1409_v46  ;;  %v1198_v49 = vmul.f32 -1.442695, %v825_v35  ;;  %v817_v54 = vadd.f32 %v1835_v60, %v816_v47 }
 0x28f   :  { %v1411_v56 = vpop.eup %1410  ;;  %1434 = vpow2.f32 %v1195_v45 }
 0x290   :  { %1436 = vrcp.f32 %v883_v48  ;;  %v881_v0 = vadd.f32 1.0, %v1411_v56  ;;  %v1196_v1 = vmul.f32 -1.442695, %v817_v54 }
 0x291   :  { %v1413_v2 = vpop.eup %1412  ;;  %1438 = vpow2.f32 %v1198_v49 }
 0x292   :  { %v1415_v3 = vpop.eup %1414  ;;  %1008 = vrot.lane.b32.xlu0 %v1413_v2, %s1463_s6  ;;  %1440 = vpow2.f32 %v1196_v1  ;;  %v945_v2 = vpop.permute.xlu0 %944 }
 0x293   :  { %v1417_v4 = vpop.eup %1416  ;;  %v886_v8 = vadd.f32 1.0, %v1415_v3  ;;  %1442 = vrcp.f32 %v881_v0  ;;  %v947_v3 = vpop.permute.xlu1 %946 }
 0x294   :  { %v1419_v10 = vpop.eup %1418 }
 0x295   :  { %v1421_v12 = vpop.eup %1420  ;;  %1444 = vrcp.f32 %v886_v8  ;;  %v884_v14 = vadd.f32 1.0, %v1419_v10 }
 0x296   :  { %v1423_v60 = vpop.eup %1422  ;;  %1004 = vrot.lane.b32.xlu0 %v1417_v4, %s1463_s6  ;;  %1010 = vrot.lane.b32.xlu1 %v1421_v12, %s1463_s6  ;;  %v941_v4 = vpop.permute.xlu0 %940 }
 0x297   :  { %v1425_v16 = vpop.eup %1424  ;;  %v887_v17 = vadd.f32 1.0, %v1423_v60  ;;  %1446 = vrcp.f32 %v884_v14  ;;  %v943_v8 = vpop.permute.xlu1 %942 }
 0x298   :  { %v1427_v18 = vpop.eup %1426 }
 0x299   :  { %v1429_v20 = vpop.eup %1428  ;;  %1448 = vrcp.f32 %v887_v17  ;;  %v885_v22 = vadd.f32 1.0, %v1427_v18 }
 0x29a   :  { %v1431_v23 = vpop.eup %1430  ;;  %1006 = vrot.lane.b32.xlu1 %v1425_v16, %s1463_s6  ;;  %1016 = vrot.lane.b32.xlu0 %v1429_v20, %s1463_s6  ;;  %v953_v10 = vpop.permute.xlu0 %952 }
 0x29b   :  { %v1433_v24 = vpop.eup %1432  ;;  %1450 = vrcp.f32 %v885_v22  ;;  %v890_v38 = vadd.f32 1.0, %v1431_v23  ;;  %v955_v12 = vpop.permute.xlu1 %954 }
 0x29c   :  { %v1435_v29 = vpop.eup %1434 }
 0x29d   :  { %v1437_v34 = vpop.eup %1436  ;;  %v888_v36 = vadd.f32 1.0, %v1435_v29  ;;  %v1054_v29 = vsel %vm702_vm3, %v1589_v51, %v1674_v44 }
 0x29e   :  { %1012 = vrot.lane.b32.xlu0 %v1433_v24, %s1463_s6  ;;  %1018 = vrot.lane.b32.xlu1 %v1437_v34, %s1463_s6  ;;  %v1439_v30 = vpop.eup %1438  ;;  %v949_v14 = vpop.permute.xlu0 %948  ;;  %v1070_v34 = vsel %vm31_vm0, %v1054_v29, %v945_v2  ;;  %v1059_v2 = vsel %vm702_vm3, %v1622_v33, %v1691_v19  ;;  %v1057_v29 = vsel %vm702_vm3, %v1629_v42, %v1688_v15 }
 0x29f   :  { %1452 = vrcp.f32 %v888_v36  ;;  %v1441_v40 = vpop.eup %1440  ;;  %v891_v46 = vadd.f32 1.0, %v1439_v30  ;;  %v951_v60 = vpop.permute.xlu1 %950 }
 0x2a0   :  { %v1443_v43 = vpop.eup %1442  ;;  %v889_v45 = vadd.f32 1.0, %v1441_v40  ;;  %1454 = vrcp.f32 %v890_v38 }
 0x2a2   :  { %v1445_v35 = vpop.eup %1444  ;;  %1014 = vrot.lane.b32.xlu1 %v1443_v43, %s1463_s6  ;;  %1456 = vrcp.f32 %v889_v45  ;;  %v961_v16 = vpop.permute.xlu0 %960  ;;  %v1052_v43 = vsel %vm702_vm3, %v1605_v9, %v1685_v7  ;;  %v1055_v45 = vsel %vm702_vm3, %v1596_v62, %v1677_v50  ;;  %v1053_v62 = vsel %vm702_vm3, %v1602_v6, %v1680_v61 }
 0x2a3   :  { %1024 = vrot.lane.b32.xlu0 %v1445_v35, %s1463_s6  ;;  %1458 = vrcp.f32 %v891_v46  ;;  %v1869_v17 = vpop.permute.xlu1 %962  ;;  %v1068_v51 = vsel %vm31_vm0, %v1052_v43, %v941_v4  ;;  %v1071_v44 = vsel %vm31_vm0, %v1055_v45, %v947_v3  ;;  %v1058_v50 = vsel %vm702_vm3, %v1617_v25, %v1695_v28 }
 0x2a4   :  { %v1447_v47 = vpop.eup %1446  ;;  %v1075_v4 = vsel %vm31_vm0, %v1059_v2, %v955_v12  ;;  %v1062_v12 = vsel %vm702_vm3, %v1639_v57, %v1715_v52  ;;  %v1060_v57 = vsel %vm702_vm3, %v1641_v58, %v1698_v31  ;;  %v1063_v52 = vsel %vm702_vm3, %v1648_v5, %v1700_v37 }
 0x2a5   :  { %v1061_v37 = vsel %vm702_vm3, %v1652_v11, %v1706_v41 }
 0x2a6   :  { %v1449_v48 = vpop.eup %1448  ;;  %v1871_v18 = vpop.permute.xlu0 %956 }
 0x2a7   :  { %1020 = vrot.lane.b32.xlu0 %v1447_v47, %s1463_s6  ;;  %1026 = vrot.lane.b32.xlu1 %v1449_v48, %s1463_s6  ;;  %v1873_v20 = vpop.permute.xlu1 %958 }
 0x2a8   :  { %v1451_v49 = vpop.eup %1450 }
 0x2aa   :  { %v1875_v22 = vpop.permute.xlu0 %968 }
 0x2ab   :  { %1022 = vrot.lane.b32.xlu1 %v1451_v49, %s1463_s6  ;;  %v1877_v23 = vpop.permute.xlu1 %970  ;;  %v1069_v49 = vsel %vm31_vm0, %v1053_v62, %v943_v8 }
 0x2ac   :  { %v1453_v54 = vpop.eup %1452 }
 0x2ad   :  { %1028 = vrot.lane.b32.xlu0 %v1453_v54, %s1463_s6  ;;  %v1455_v56 = vpop.eup %1454  ;;  %v1074_v54 = vsel %vm31_vm0, %v1058_v50, %v953_v10 }
 0x2ae   :  { %v1879_v24 = vpop.permute.xlu0 %964 }
 0x2af   :  { %v1457_v0 = vpop.eup %1456  ;;  %v1885_v36 = vpop.permute.xlu1 %966 }
 0x2b0   :  { %1030 = vrot.lane.b32.xlu1 %v1457_v0, %s1463_s6  ;;  %v1459_v1 = vpop.eup %1458 }
 0x2b1   :  { %1032 = vrot.lane.b32.xlu0 %v1455_v56, %s1463_s6 }
 0x2b4   :  { %1034 = vrot.lane.b32.xlu1 %v1459_v1, %s1463_s6  ;;  %v1056_v1 = vsel %vm702_vm3, %v1613_v21, %v1682_v63 }
 0x2b5   :  { %v1072_v3 = vsel %vm31_vm0, %v1056_v1, %v949_v14  ;;  %v1073_v14 = vsel %vm31_vm0, %v1057_v29, %v951_v60  ;;  %v1076_v60 = vsel %vm31_vm0, %v1060_v57, %v1871_v18 }
 0x304   :  { %v1009_v38 = vpop.permute.xlu0 %1008 }
 0x305   :  { %v1087_v30 = vsel %vm1084_vm4, %v1070_v34, %v1009_v38  ;;  %v1078_v38 = vsel %vm31_vm0, %v1062_v12, %v961_v16  ;;  %v1079_v16 = vsel %vm31_vm0, %v1063_v52, %v1869_v17  ;;  %v1077_v17 = vsel %vm31_vm0, %v1061_v37, %v1873_v20 }
 0x306   :  { %v1104_v40 = vsel %vm1101_vm5, %v1087_v30, 0.0 }
 0x307   :  { %1120 = vst [vmem:[%s2041_s7 + $0x10] sm:$0xff] %v1104_v40 }
 0x308   :  { %v1005_v35 = vpop.permute.xlu0 %1004  ;;  %v1011_v46 = vpop.permute.xlu1 %1010 }
 0x309   :  { %v1085_v47 = vsel %vm1084_vm4, %v1068_v51, %v1005_v35  ;;  %v1088_v48 = vsel %vm1084_vm4, %v1071_v44, %v1011_v46  ;;  %v1064_v35 = vsel %vm702_vm3, %v1663_v27, %v1717_v53  ;;  %v1066_v27 = vsel %vm702_vm3, %v1661_v26, %v1728_v13 }
 0x30a   :  { %v1102_v9 = vsel %vm1101_vm5, %v1085_v47, 0.0  ;;  %v1105_v7 = vsel %vm1101_vm5, %v1088_v48, 0.0  ;;  %v1080_v11 = vsel %vm31_vm0, %v1064_v35, %v1879_v24  ;;  %v1065_v53 = vsel %vm702_vm3, %v1671_v39, %v1721_v59 }
 0x30b   :  { %1118 = vst [vmem:[%s2041_s7] sm:$0xff] %v1102_v9  ;;  %1121 = vst [vmem:[%s2041_s7 + $0x18] sm:$0xff] %v1105_v7  ;;  %v1082_v24 = vsel %vm31_vm0, %v1066_v27, %v1875_v22  ;;  %v1081_v9 = vsel %vm31_vm0, %v1065_v53, %v1885_v36  ;;  %v1067_v59 = vsel %vm702_vm3, %v1666_v32, %v1719_v55 }
 0x30c   :  { %v1007_v56 = vpop.permute.xlu1 %1006  ;;  %v1017_v0 = vpop.permute.xlu0 %1016  ;;  %v1083_v22 = vsel %vm31_vm0, %v1067_v59, %v1877_v23 }
 0x30d   :  { %v1086_v6 = vsel %vm1084_vm4, %v1069_v49, %v1007_v56  ;;  %v1091_v61 = vsel %vm1084_vm4, %v1074_v54, %v1017_v0 }
 0x30e   :  { %v1103_v25 = vsel %vm1101_vm5, %v1086_v6, 0.0  ;;  %v1108_v28 = vsel %vm1101_vm5, %v1091_v61, 0.0 }
 0x30f   :  { %1119 = vst [vmem:[%s2041_s7 + $0x8] sm:$0xff] %v1103_v25  ;;  %1124 = vst [vmem:[%s2041_s7 + $0x30] sm:$0xff] %v1108_v28 }
 0x310   :  { %v1013_v8 = vpop.permute.xlu0 %1012  ;;  %v1019_v10 = vpop.permute.xlu1 %1018 }
 0x311   :  { %v1089_v21 = vsel %vm1084_vm4, %v1072_v3, %v1013_v8  ;;  %v1092_v63 = vsel %vm1084_vm4, %v1075_v4, %v1019_v10 }
 0x312   :  { %v1106_v33 = vsel %vm1101_vm5, %v1089_v21, 0.0  ;;  %v1109_v19 = vsel %vm1101_vm5, %v1092_v63, 0.0 }
 0x313   :  { %1122 = vst [vmem:[%s2041_s7 + $0x20] sm:$0xff] %v1106_v33  ;;  %1125 = vst [vmem:[%s2041_s7 + $0x38] sm:$0xff] %v1109_v19 }
 0x314   :  { %v1015_v34 = vpop.permute.xlu1 %1014 }
 0x315   :  { %v1025_v30 = vpop.permute.xlu0 %1024  ;;  %v1090_v42 = vsel %vm1084_vm4, %v1073_v14, %v1015_v34 }
 0x316   :  { %v1095_v15 = vsel %vm1084_vm4, %v1078_v38, %v1025_v30  ;;  %v1107_v40 = vsel %vm1101_vm5, %v1090_v42, 0.0 }
 0x317   :  { %v1112_v43 = vsel %vm1101_vm5, %v1095_v15, 0.0  ;;  %1123 = vst [vmem:[%s2041_s7 + $0x28] sm:$0xff] %v1107_v40 }
 0x318   :  { %1128 = vst [vmem:[%s2041_s7 + $0x50] sm:$0xff] %v1112_v43 }
 0x319   :  { %v1021_v45 = vpop.permute.xlu0 %1020  ;;  %v1027_v51 = vpop.permute.xlu1 %1026 }
 0x31a   :  { %v1093_v44 = vsel %vm1084_vm4, %v1076_v60, %v1021_v45  ;;  %v1096_v58 = vsel %vm1084_vm4, %v1079_v16, %v1027_v51 }
 0x31b   :  { %v1110_v31 = vsel %vm1101_vm5, %v1093_v44, 0.0  ;;  %v1113_v5 = vsel %vm1101_vm5, %v1096_v58, 0.0 }
 0x31c   :  { %1126 = vst [vmem:[%s2041_s7 + $0x40] sm:$0xff] %v1110_v31  ;;  %1129 = vst [vmem:[%s2041_s7 + $0x58] sm:$0xff] %v1113_v5 }
 0x31d   :  { %v1023_v18 = vpop.permute.xlu1 %1022 }
 0x31e   :  { %v1094_v46 = vsel %vm1084_vm4, %v1077_v17, %v1023_v18 }
 0x31f   :  { %v1111_v41 = vsel %vm1101_vm5, %v1094_v46, 0.0  ;;  %v1029_v47 = vpop.permute.xlu0 %1028 }
 0x320   :  { %1127 = vst [vmem:[%s2041_s7 + $0x48] sm:$0xff] %v1111_v41  ;;  %v1097_v48 = vsel %vm1084_vm4, %v1080_v11, %v1029_v47 }
 0x321   :  { %v1114_v20 = vsel %vm1101_vm5, %v1097_v48, 0.0 }
 0x322   :  { %1130 = vst [vmem:[%s2041_s7 + $0x60] sm:$0xff] %v1114_v20  ;;  %v1031_v62 = vpop.permute.xlu1 %1030 }
 0x323   :  { %v1033_v7 = vpop.permute.xlu0 %1032  ;;  %v1098_v26 = vsel %vm1084_vm4, %v1081_v9, %v1031_v62 }
 0x324   :  { %v1099_v50 = vsel %vm1084_vm4, %v1082_v24, %v1033_v7  ;;  %v1115_v39 = vsel %vm1101_vm5, %v1098_v26, 0.0 }
 0x325   :  { %v1116_v13 = vsel %vm1101_vm5, %v1099_v50, 0.0  ;;  %1131 = vst [vmem:[%s2041_s7 + $0x68] sm:$0xff] %v1115_v39 }
 0x326   :  { %1132 = vst [vmem:[%s2041_s7 + $0x70] sm:$0xff] %v1116_v13  ;;  %v1035_v36 = vpop.permute.xlu1 %1034 }
 0x327   :  { %v1100_v49 = vsel %vm1084_vm4, %v1083_v22, %v1035_v36 }
 0x328   :  { %v1117_v54 = vsel %vm1101_vm5, %v1100_v49, 0.0 }
 0x329   :  { %1133 = vst [vmem:[%s2041_s7 + $0x78] sm:$0xff] %v1117_v54 }

</bundles_post_ra>
